<compile_context>
chip_gen: v7x
topology: tpu7x:2x2x1
jax: 0.10.0
libtpu: 0.0.40
codegen_flags: <defaults>
</compile_context>

<pallas_src>
import math
import functools

import jax
import jax.numpy as jnp
from jax.experimental import pallas as pl
from jax.experimental.pallas import tpu as pltpu

EPS = 1e-5  # nn.LayerNorm default


def _layernorm(x_f32, gamma, beta):
    mu = jnp.mean(x_f32, axis=-1, keepdims=True)
    var = jnp.mean((x_f32 - mu) ** 2, axis=-1, keepdims=True)
    return (x_f32 - mu) * jax.lax.rsqrt(var + EPS) * gamma + beta


def transformer_block_kernel(
    x_ref,                       # (1, S, D) bf16 -- full sequence (K/V source, query tiles, residual)
    g1_ref, be1_ref,             # LayerNorm1 weight / bias        (1, D)    f32
    wq_ref, bq_ref,              # Q projection  (D, D)  bf16, (1, D)   f32
    wkv_ref, bkv_ref,            # fused K|V     (D, 2D) bf16, (1, 2D)  f32
    wo_ref, bo_ref,              # out_proj      (H, hd, D) bf16, (1, D) f32
    g2_ref, be2_ref,             # LayerNorm2 weight / bias        (1, D)    f32
    w1_ref, bf1_ref,             # FFN linear1   (D, d_ff) bf16, (1, d_ff) f32
    w2_ref, bf2_ref,             # FFN linear2   (d_ff, D) bf16, (1, D)    f32
    o_ref,                       # (1, TQ, D) bf16
    k_s, v_s,                    # VMEM (H, S, hd) bf16 scratch (head-major K / V)
    *, n_heads: int, tq: int, tkv: int, seq_len: int, proj_chunk: int,
    approx_recip: bool, exp_bf16: bool,
):
    qi = pl.program_id(1)
    D = x_ref.shape[-1]
    hd = D // n_heads
    scale = 1.0 / math.sqrt(hd)

    # ---- Once per batch element (qi == 0): LN1 + K/V projection, chunked over S so the
    #      f32 transients stay bounded (O(proj_chunk*D) instead of O(S*3D)). ----
    # Correctness relies on all qi of this batch element executing after this init
    # (row-major traversal, qi axis marked "arbitrary"). Do not mark qi "parallel".
    @pl.when(qi == 0)
    def _():
        n_chunks = seq_len // proj_chunk

        @pl.loop(0, n_chunks)
        def _(ci):
            start = pl.multiple_of(ci * proj_chunk, proj_chunk)
            xs = x_ref[0, pl.ds(start, proj_chunk), :].astype(jnp.float32)
            n1 = _layernorm(xs, g1_ref[0], be1_ref[0])
            kv = jnp.dot(n1.astype(jnp.bfloat16), wkv_ref[...],
                         preferred_element_type=jnp.float32) + bkv_ref[0]    # (c, 2D)
            kv = kv.astype(jnp.bfloat16)
            # NOTE: hd < 128 makes these per-head writes lane-sparse; prefer hd >= 128
            # models (or a lane-dense split-at-matmul layout) for peak perf.
            for h in range(n_heads):                                         # static
                k_s[h, pl.ds(start, proj_chunk), :] = kv[:,     h * hd:      (h + 1) * hd]
                v_s[h, pl.ds(start, proj_chunk), :] = kv[:, D + h * hd:  D + (h + 1) * hd]

    # ---- Per query tile: LN1 (cheap recompute on tq rows) + Q projection ----
    q_start = pl.multiple_of(qi * tq, tq)
    x_tile = x_ref[0, pl.ds(q_start, tq), :].astype(jnp.float32)             # (TQ, D)
    n1_q = _layernorm(x_tile, g1_ref[0], be1_ref[0])
    q = jnp.dot(n1_q.astype(jnp.bfloat16), wq_ref[...],
                preferred_element_type=jnp.float32) + bq_ref[0]              # (TQ, D)
    q = (q * scale).astype(jnp.bfloat16)      # 1/sqrt(hd) folded in once, outside KV loop
    q_h = jnp.stack([q[:, h * hd:(h + 1) * hd] for h in range(n_heads)], axis=0)  # (H,TQ,hd)

    # ---- Multi-head self-attention (no mask, is_causal=False), online softmax over KV ----
    num_kv = seq_len // tkv

    def kv_step(j, carry):
        m, l, acc = carry
        k_start = pl.multiple_of(j * tkv, tkv)
        k = k_s[:, pl.ds(k_start, tkv), :]                                   # (H, TKV, hd)
        v = v_s[:, pl.ds(k_start, tkv), :]
        s = jnp.einsum("hqd,hkd->hqk", q_h, k,
                       preferred_element_type=jnp.float32)                   # (H, TQ, TKV)
        m_new = jnp.maximum(m, jnp.max(s, axis=-1, keepdims=True))
        alpha = jnp.exp(m - m_new)
        if exp_bf16:
            # v6e/v7x: bf16 EUP path (~2x exp throughput); l accumulation stays f32.
            p = jnp.exp((s - m_new).astype(jnp.bfloat16))
            l_new = alpha * l + jnp.sum(p.astype(jnp.float32), axis=-1, keepdims=True)
        else:
            p32 = jnp.exp(s - m_new)
            l_new = alpha * l + jnp.sum(p32, axis=-1, keepdims=True)
            p = p32.astype(jnp.bfloat16)
        acc_new = alpha * acc + jnp.einsum("hqk,hkd->hqd", p, v,
                                           preferred_element_type=jnp.float32)
        return m_new, l_new, acc_new

    m0 = jnp.full((n_heads, tq, 1), -jnp.inf, jnp.float32)
    l0 = jnp.zeros((n_heads, tq, 1), jnp.float32)
    acc0 = jnp.zeros((n_heads, tq, hd), jnp.float32)
    m, l, acc = jax.lax.fori_loop(0, num_kv, kv_step, (m0, l0, acc0),
                                  unroll=(num_kv <= 8))

    inv_l = pl.reciprocal(l, approx=approx_recip)                            # (H, TQ, 1)
    attn_h = (acc * inv_l).astype(jnp.bfloat16)                              # (H, TQ, hd)

    # Head merge + out_proj fused: head-batched matmul against wo (H, hd, D), sum heads.
    per_head = jnp.einsum("hqd,hdk->hqk", attn_h, wo_ref[...],
                          preferred_element_type=jnp.float32)                # (H, TQ, D)
    attn_out = jnp.sum(per_head, axis=0) + bo_ref[0]                         # (TQ, D)
    x1 = x_tile + attn_out                                                   # residual 1

    # ---- LayerNorm 2 + FFN: Linear -> GELU(exact erf) -> Linear ----
    n2 = _layernorm(x1, g2_ref[0], be2_ref[0])
    h1 = jnp.dot(n2.astype(jnp.bfloat16), w1_ref[...],
                 preferred_element_type=jnp.float32) + bf1_ref[0]            # (TQ, d_ff)
    g = 0.5 * h1 * (1.0 + jax.lax.erf(h1 * (1.0 / math.sqrt(2.0))))
    # TODO(synk): optional tanh-approx GELU if the FFN profiles VALU-bound on v5e.
    ffn = jnp.dot(g.astype(jnp.bfloat16), w2_ref[...],
                  preferred_element_type=jnp.float32) + bf2_ref[0]           # (TQ, D)

    o_ref[0] = (x1 + ffn).astype(o_ref.dtype)                                # residual 2


_PARAM_ORDER = ("g1", "be1", "wq", "bq", "wkv", "bkv", "wo", "bo",
                "g2", "be2", "w1", "bf1", "w2", "bf2")


def _pick_tile(n, target):
    """Largest multiple of 8 that divides n and is <= target (or n itself if n <= target)."""
    if n <= target:
        return n
    t = (target // 8) * 8
    while t >= 8:
        if n % t == 0:
            return t
        t -= 8
    return n


def _vmem_capacity_bytes():
    try:
        cap = getattr(pltpu.get_tpu_info(), "vmem_capacity_bytes", None)
        if cap:
            return int(cap)
    except Exception:
        pass
    return 64 * 1024 * 1024   # conservative (v7x per-TensorCore)


def _tpu_generation():
    try:
        kind = jax.devices()[0].device_kind.lower()
    except Exception:
        return 0
    for g in (7, 6, 5, 4, 3):
        if ("v%d" % g) in kind:
            return g
    return 0


def transformer_block(x, params, n_heads, *, tq=None, tkv=None,
                      vmem_limit_bytes=None, approx_recip=True, exp_bf16=None):
    B, S, D = x.shape
    assert D % n_heads == 0
    hd = D // n_heads
    d_ff = params["w1"].shape[1]

    # Generation-aware defaults: v5e/v6e (128 MiB VMEM) -> big tiles / high limit;
    # v7x (64 MiB) -> smaller tiles / ~56 MiB limit.
    cap = _vmem_capacity_bytes()
    big_vmem = cap >= 100 * 1024 * 1024
    if vmem_limit_bytes is None:
        vmem_limit_bytes = max(32 << 20, min(cap - (8 << 20), 112 << 20))
    tile_target = 512 if big_vmem else 256
    if exp_bf16 is None:
        exp_bf16 = _tpu_generation() >= 6     # bf16 EUP on v6e/v7x, f32 on v5e and older

    tq = _pick_tile(S, tile_target) if tq is None else tq
    tkv = _pick_tile(S, tile_target) if tkv is None else tkv
    proj_chunk = _pick_tile(S, 512)
    assert S % tq == 0 and S % tkv == 0 and S % proj_chunk == 0
    nq = S // tq

    # out_proj weight pre-shaped head-major (host side, free) so the head merge fuses
    # into the projection inside the kernel.
    wo_h = params["wo"].reshape(n_heads, hd, D)

    param_arrays = [wo_h if n == "wo" else params[n] for n in _PARAM_ORDER]

    def const_spec(arr):
        # Constant index_map -> single buffer: double-buffering these blocks would only
        # double their VMEM footprint.
        return pl.BlockSpec(arr.shape, lambda b, q: (0,) * arr.ndim,
                            pipeline_mode=pl.Buffered(1))

    in_specs = [pl.BlockSpec((1, S, D), lambda b, q: (b, 0, 0))]   # full-seq x (constant in q)
    in_specs += [const_spec(a) for a in param_arrays]

    kernel = functools.partial(
        transformer_block_kernel, n_heads=n_heads, tq=tq, tkv=tkv, seq_len=S,
        proj_chunk=proj_chunk, approx_recip=approx_recip, exp_bf16=exp_bf16)

    flops = 2 * B * S * D * (4 * D + 2 * d_ff) + 4 * B * S * S * D
    transcendentals = B * n_heads * S * S + B * S * (d_ff + 8)
    param_bytes = sum(int(a.size) * a.dtype.itemsize for a in param_arrays)
    bytes_accessed = param_bytes + 2 * int(x.size) * x.dtype.itemsize

    return pl.pallas_call(
        kernel,
        out_shape=jax.ShapeDtypeStruct((B, S, D), x.dtype),
        grid_spec=pltpu.PrefetchScalarGridSpec(
            num_scalar_prefetch=0,
            grid=(B, nq),
            in_specs=in_specs,
            out_specs=pl.BlockSpec((1, tq, D), lambda b, q: (b, q, 0)),
            scratch_shapes=[
                pltpu.VMEM((n_heads, S, hd), jnp.bfloat16),   # K (head-major, full S)
                pltpu.VMEM((n_heads, S, hd), jnp.bfloat16),   # V (head-major, full S)
            ],
        ),
        compiler_params=pltpu.CompilerParams(
            # qi carries the K/V-scratch dependence -> must stay sequential ("arbitrary").
            dimension_semantics=("parallel", "arbitrary"),
            vmem_limit_bytes=vmem_limit_bytes,
        ),
        cost_estimate=pl.CostEstimate(flops=flops, transcendentals=transcendentals,
                                      bytes_accessed=bytes_accessed),
    )(x, *param_arrays)


def reference(x, p, n_heads):
    """Pure-JAX f32 reference (weights/inputs upcast from their storage dtype)."""
    x = x.astype(jnp.float32)
    B, S, D = x.shape
    hd = D // n_heads
    f32 = lambda a: a.astype(jnp.float32)

    def ln(y, g, b):
        mu = jnp.mean(y, -1, keepdims=True)
        var = jnp.mean((y - mu) ** 2, -1, keepdims=True)
        return (y - mu) / jnp.sqrt(var + EPS) * g[0] + b[0]

    n1 = ln(x, f32(p["g1"]), f32(p["be1"]))
    q = n1 @ f32(p["wq"]) + f32(p["bq"])[0]
    kv = n1 @ f32(p["wkv"]) + f32(p["bkv"])[0]
    k, v = kv[..., :D], kv[..., D:]
    q = q.reshape(B, S, n_heads, hd).transpose(0, 2, 1, 3)
    k = k.reshape(B, S, n_heads, hd).transpose(0, 2, 1, 3)
    v = v.reshape(B, S, n_heads, hd).transpose(0, 2, 1, 3)
    s = jnp.einsum("bhqd,bhkd->bhqk", q, k) / math.sqrt(hd)
    a = jax.nn.softmax(s, axis=-1)
    o = jnp.einsum("bhqk,bhkd->bhqd", a, v).transpose(0, 2, 1, 3).reshape(B, S, D)
    attn_out = o @ f32(p["wo"]) + f32(p["bo"])[0]
    x1 = x + attn_out
    n2 = ln(x1, f32(p["g2"]), f32(p["be2"]))
    h1 = n2 @ f32(p["w1"]) + f32(p["bf1"])[0]
    g = 0.5 * h1 * (1.0 + jax.lax.erf(h1 / math.sqrt(2.0)))
    return x1 + g @ f32(p["w2"]) + f32(p["bf2"])[0]


if __name__ == "__main__":
    B, S, D, H, DFF = 2, 8, 32, 4, 64
    key = jax.random.PRNGKey(0)
    ks = jax.random.split(key, 14)

    x = jax.random.normal(ks[0], (B, S, D), dtype=jnp.float32).astype(jnp.bfloat16)

    def winit(k, shape):
        return (0.02 * jax.random.normal(k, shape, dtype=jnp.float32)).astype(jnp.bfloat16)

    def binit(k, shape):
        return 0.02 * jax.random.normal(k, shape, dtype=jnp.float32)

    params = {
        # LayerNorms: gamma ~ 1, beta ~ 0 (perturbed so the check exercises them)
        "g1": (1.0 + 0.1 * jax.random.normal(ks[1], (1, D))).astype(jnp.float32),
        "be1": binit(ks[2], (1, D)),
        "g2": (1.0 + 0.1 * jax.random.normal(ks[3], (1, D))).astype(jnp.float32),
        "be2": binit(ks[4], (1, D)),
        # in_proj split: Q (D, D) and fused K|V (D, 2D), stored transposed for x @ W
        "wq": winit(ks[5], (D, D)), "bq": binit(ks[6], (1, D)),
        "wkv": winit(ks[7], (D, 2 * D)), "bkv": binit(ks[8], (1, 2 * D)),
        # out_proj, transposed (D, D)
        "wo": winit(ks[9], (D, D)), "bo": binit(ks[10], (1, D)),
        # FFN: linear1 (D, d_ff) transposed, linear2 (d_ff, D) transposed
        "w1": winit(ks[11], (D, DFF)), "bf1": binit(ks[12], (1, DFF)),
        "w2": winit(ks[13], (DFF, D)), "bf2": jnp.zeros((1, D), jnp.float32),
    }

    out = transformer_block(x, params, H)
    out = jax.block_until_ready(out)

    ref = reference(x, params, H)
    assert out.shape == (B, S, D)
    assert jnp.allclose(out.astype(jnp.float32), ref, atol=2e-2, rtol=2e-2), \
        "mismatch vs pure-JAX reference"

    print("KERNEL_OK")
</pallas_src>

<mosaic_0001>
module attributes {stable_mosaic.version = 11 : i64} {
  func.func @transformer_block_kernel(%arg0: i32, %arg1: i32, %arg2: memref<1x8x32xbf16, #tpu.memory_space<vmem>>, %arg3: memref<1x32xf32, #tpu.memory_space<vmem>>, %arg4: memref<1x32xf32, #tpu.memory_space<vmem>>, %arg5: memref<32x32xbf16, #tpu.memory_space<vmem>>, %arg6: memref<1x32xf32, #tpu.memory_space<vmem>>, %arg7: memref<32x64xbf16, #tpu.memory_space<vmem>>, %arg8: memref<1x64xf32, #tpu.memory_space<vmem>>, %arg9: memref<4x8x32xbf16, #tpu.memory_space<vmem>>, %arg10: memref<1x32xf32, #tpu.memory_space<vmem>>, %arg11: memref<1x32xf32, #tpu.memory_space<vmem>>, %arg12: memref<1x32xf32, #tpu.memory_space<vmem>>, %arg13: memref<32x64xbf16, #tpu.memory_space<vmem>>, %arg14: memref<1x64xf32, #tpu.memory_space<vmem>>, %arg15: memref<64x32xbf16, #tpu.memory_space<vmem>>, %arg16: memref<1x32xf32, #tpu.memory_space<vmem>>, %arg17: memref<1x8x32xbf16, #tpu.memory_space<vmem>>, %arg18: memref<4x8x8xbf16, #tpu.memory_space<vmem>>, %arg19: memref<4x8x8xbf16, #tpu.memory_space<vmem>>) attributes {dimension_semantics = [#tpu.dimension_semantics<parallel>, #tpu.dimension_semantics<arbitrary>], iteration_bounds = array<i64: 2, 1>, scalar_prefetch = 0 : i64, scratch_operands = 2 : i64, tpu.core_type = #tpu.core_type<tc>, window_params = [{transform_indices = @transform_0, window_bounds = array<i64: 1, 8, 32>}, {pipeline_mode = #tpu.pipeline_mode<synchronous>, transform_indices = @transform_1, window_bounds = array<i64: 1, 32>}, {pipeline_mode = #tpu.pipeline_mode<synchronous>, transform_indices = @transform_2, window_bounds = array<i64: 1, 32>}, {pipeline_mode = #tpu.pipeline_mode<synchronous>, transform_indices = @transform_3, window_bounds = array<i64: 32, 32>}, {pipeline_mode = #tpu.pipeline_mode<synchronous>, transform_indices = @transform_4, window_bounds = array<i64: 1, 32>}, {pipeline_mode = #tpu.pipeline_mode<synchronous>, transform_indices = @transform_5, window_bounds = array<i64: 32, 64>}, {pipeline_mode = #tpu.pipeline_mode<synchronous>, transform_indices = @transform_6, window_bounds = array<i64: 1, 64>}, {pipeline_mode = #tpu.pipeline_mode<synchronous>, transform_indices = @transform_7, window_bounds = array<i64: 4, 8, 32>}, {pipeline_mode = #tpu.pipeline_mode<synchronous>, transform_indices = @transform_8, window_bounds = array<i64: 1, 32>}, {pipeline_mode = #tpu.pipeline_mode<synchronous>, transform_indices = @transform_9, window_bounds = array<i64: 1, 32>}, {pipeline_mode = #tpu.pipeline_mode<synchronous>, transform_indices = @transform_10, window_bounds = array<i64: 1, 32>}, {pipeline_mode = #tpu.pipeline_mode<synchronous>, transform_indices = @transform_11, window_bounds = array<i64: 32, 64>}, {pipeline_mode = #tpu.pipeline_mode<synchronous>, transform_indices = @transform_12, window_bounds = array<i64: 1, 64>}, {pipeline_mode = #tpu.pipeline_mode<synchronous>, transform_indices = @transform_13, window_bounds = array<i64: 64, 32>}, {pipeline_mode = #tpu.pipeline_mode<synchronous>, transform_indices = @transform_14, window_bounds = array<i64: 1, 32>}, {transform_indices = @transform_15, window_bounds = array<i64: 1, 8, 32>}]} {
    %c0_i32 = arith.constant 0 : i32
    %0 = arith.cmpi eq, %arg1, %c0_i32 : i32
    %1 = arith.extui %0 : i1 to i32
    %c0_i32_0 = arith.constant 0 : i32
    %2 = arith.cmpi ne, %1, %c0_i32_0 : i32
    scf.if %2 {
      %c0_i32_61 = arith.constant 0 : i32
      %c1_i32_62 = arith.constant 1 : i32
      %154 = arith.muli %c0_i32_61, %c1_i32_62 : i32
      %c0_i32_63 = arith.constant 0 : i32
      %155 = arith.addi %c0_i32_63, %154 : i32
      %c8_i32_64 = arith.constant 8 : i32
      %156 = arith.muli %155, %c8_i32_64 : i32
      %157 = tpu.assume_multiple %156, 8 : i32
      %c0_65 = arith.constant 0 : index
      %158 = arith.index_cast %157 : i32 to index
      %c0_66 = arith.constant 0 : index
      %159 = vector.load %arg2[%c0_65, %158, %c0_66] : memref<1x8x32xbf16, #tpu.memory_space<vmem>>, vector<1x8x32xbf16>
      %160 = vector.shape_cast %159 : vector<1x8x32xbf16> to vector<8x32xbf16>
      %161 = arith.extf %160 : vector<8x32xbf16> to vector<8x32xf32>
      %c0_67 = arith.constant 0 : index
      %c0_68 = arith.constant 0 : index
      %162 = vector.load %arg3[%c0_67, %c0_68] : memref<1x32xf32, #tpu.memory_space<vmem>>, vector<1x32xf32>
      %163 = vector.shape_cast %162 : vector<1x32xf32> to vector<32xf32>
      %c0_69 = arith.constant 0 : index
      %c0_70 = arith.constant 0 : index
      %164 = vector.load %arg4[%c0_69, %c0_70] : memref<1x32xf32, #tpu.memory_space<vmem>>, vector<1x32xf32>
      %165 = vector.shape_cast %164 : vector<1x32xf32> to vector<32xf32>
      %cst_71 = arith.constant dense<0.000000e+00> : vector<8xf32>
      %166 = vector.multi_reduction <add>, %161, %cst_71 [1] : vector<8x32xf32> to vector<8xf32>
      %167 = vector.shape_cast %166 : vector<8xf32> to vector<8x1xf32>
      %cst_72 = arith.constant 3.200000e+01 : f32
      %168 = vector.broadcast %cst_72 : f32 to vector<8x1xf32>
      %169 = arith.divf %167, %168 : vector<8x1xf32>
      %170 = vector.broadcast %169 : vector<8x1xf32> to vector<8x32xf32>
      %171 = arith.subf %161, %170 : vector<8x32xf32>
      %172 = arith.mulf %171, %171 : vector<8x32xf32>
      %cst_73 = arith.constant dense<0.000000e+00> : vector<8xf32>
      %173 = vector.multi_reduction <add>, %172, %cst_73 [1] : vector<8x32xf32> to vector<8xf32>
      %174 = vector.shape_cast %173 : vector<8xf32> to vector<8x1xf32>
      %cst_74 = arith.constant 3.200000e+01 : f32
      %175 = vector.broadcast %cst_74 : f32 to vector<8x1xf32>
      %176 = arith.divf %174, %175 : vector<8x1xf32>
      %177 = vector.broadcast %169 : vector<8x1xf32> to vector<8x32xf32>
      %178 = arith.subf %161, %177 : vector<8x32xf32>
      %cst_75 = arith.constant 9.99999974E-6 : f32
      %179 = vector.broadcast %cst_75 : f32 to vector<8x1xf32>
      %180 = arith.addf %176, %179 : vector<8x1xf32>
      %181 = math.rsqrt %180 : vector<8x1xf32>
      %182 = vector.broadcast %181 : vector<8x1xf32> to vector<8x32xf32>
      %183 = arith.mulf %178, %182 : vector<8x32xf32>
      %184 = vector.shape_cast %163 : vector<32xf32> to vector<1x32xf32>
      %185 = vector.broadcast %184 : vector<1x32xf32> to vector<8x32xf32>
      %186 = arith.mulf %183, %185 : vector<8x32xf32>
      %187 = vector.shape_cast %165 : vector<32xf32> to vector<1x32xf32>
      %188 = vector.broadcast %187 : vector<1x32xf32> to vector<8x32xf32>
      %189 = arith.addf %186, %188 : vector<8x32xf32>
      %190 = arith.truncf %189 : vector<8x32xf32> to vector<8x32xbf16>
      %c0_76 = arith.constant 0 : index
      %c0_77 = arith.constant 0 : index
      %191 = vector.load %arg7[%c0_76, %c0_77] : memref<32x64xbf16, #tpu.memory_space<vmem>>, vector<32x64xbf16>
      %cst_78 = arith.constant dense<0.000000e+00> : vector<8x64xf32>
      %192 = tpu.matmul %190, %191, %cst_78 {dimension_numbers = #tpu.dot_dimension_numbers<[1], [0], [0], [1], [0, 0, 1, 1], [], []>} : vector<8x32xbf16>, vector<32x64xbf16>, vector<8x64xf32> -> vector<8x64xf32>
      %c0_79 = arith.constant 0 : index
      %c0_80 = arith.constant 0 : index
      %193 = vector.load %arg8[%c0_79, %c0_80] : memref<1x64xf32, #tpu.memory_space<vmem>>, vector<1x64xf32>
      %194 = vector.shape_cast %193 : vector<1x64xf32> to vector<64xf32>
      %195 = vector.shape_cast %194 : vector<64xf32> to vector<1x64xf32>
      %196 = vector.broadcast %195 : vector<1x64xf32> to vector<8x64xf32>
      %197 = arith.addf %192, %196 : vector<8x64xf32>
      %198 = arith.truncf %197 : vector<8x64xf32> to vector<8x64xbf16>
      %199 = vector.extract_strided_slice %198 {offsets = [0, 0], sizes = [8, 8], strides = [1, 1]} : vector<8x64xbf16> to vector<8x8xbf16>
      %c0_81 = arith.constant 0 : index
      %200 = arith.index_cast %157 : i32 to index
      %c0_82 = arith.constant 0 : index
      %201 = vector.load %arg18[%c0_81, %200, %c0_82] : memref<4x8x8xbf16, #tpu.memory_space<vmem>>, vector<1x8x8xbf16>
      %202 = vector.shape_cast %201 : vector<1x8x8xbf16> to vector<8x8xbf16>
      %203 = vector.shape_cast %199 : vector<8x8xbf16> to vector<1x8x8xbf16>
      tpu.vector_store %arg18[%c0_81, %200, %c0_82], %203 {strides = array<i32>} : memref<4x8x8xbf16, #tpu.memory_space<vmem>>, vector<1x8x8xbf16>,
      %204 = vector.extract_strided_slice %198 {offsets = [0, 32], sizes = [8, 8], strides = [1, 1]} : vector<8x64xbf16> to vector<8x8xbf16>
      %c0_83 = arith.constant 0 : index
      %205 = arith.index_cast %157 : i32 to index
      %c0_84 = arith.constant 0 : index
      %206 = vector.load %arg19[%c0_83, %205, %c0_84] : memref<4x8x8xbf16, #tpu.memory_space<vmem>>, vector<1x8x8xbf16>
      %207 = vector.shape_cast %206 : vector<1x8x8xbf16> to vector<8x8xbf16>
      %208 = vector.shape_cast %204 : vector<8x8xbf16> to vector<1x8x8xbf16>
      tpu.vector_store %arg19[%c0_83, %205, %c0_84], %208 {strides = array<i32>} : memref<4x8x8xbf16, #tpu.memory_space<vmem>>, vector<1x8x8xbf16>,
      %209 = vector.extract_strided_slice %198 {offsets = [0, 8], sizes = [8, 8], strides = [1, 1]} : vector<8x64xbf16> to vector<8x8xbf16>
      %c1 = arith.constant 1 : index
      %210 = arith.index_cast %157 : i32 to index
      %c0_85 = arith.constant 0 : index
      %211 = vector.load %arg18[%c1, %210, %c0_85] : memref<4x8x8xbf16, #tpu.memory_space<vmem>>, vector<1x8x8xbf16>
      %212 = vector.shape_cast %211 : vector<1x8x8xbf16> to vector<8x8xbf16>
      %213 = vector.shape_cast %209 : vector<8x8xbf16> to vector<1x8x8xbf16>
      tpu.vector_store %arg18[%c1, %210, %c0_85], %213 {strides = array<i32>} : memref<4x8x8xbf16, #tpu.memory_space<vmem>>, vector<1x8x8xbf16>,
      %214 = vector.extract_strided_slice %198 {offsets = [0, 40], sizes = [8, 8], strides = [1, 1]} : vector<8x64xbf16> to vector<8x8xbf16>
      %c1_86 = arith.constant 1 : index
      %215 = arith.index_cast %157 : i32 to index
      %c0_87 = arith.constant 0 : index
      %216 = vector.load %arg19[%c1_86, %215, %c0_87] : memref<4x8x8xbf16, #tpu.memory_space<vmem>>, vector<1x8x8xbf16>
      %217 = vector.shape_cast %216 : vector<1x8x8xbf16> to vector<8x8xbf16>
      %218 = vector.shape_cast %214 : vector<8x8xbf16> to vector<1x8x8xbf16>
      tpu.vector_store %arg19[%c1_86, %215, %c0_87], %218 {strides = array<i32>} : memref<4x8x8xbf16, #tpu.memory_space<vmem>>, vector<1x8x8xbf16>,
      %219 = vector.extract_strided_slice %198 {offsets = [0, 16], sizes = [8, 8], strides = [1, 1]} : vector<8x64xbf16> to vector<8x8xbf16>
      %c2 = arith.constant 2 : index
      %220 = arith.index_cast %157 : i32 to index
      %c0_88 = arith.constant 0 : index
      %221 = vector.load %arg18[%c2, %220, %c0_88] : memref<4x8x8xbf16, #tpu.memory_space<vmem>>, vector<1x8x8xbf16>
      %222 = vector.shape_cast %221 : vector<1x8x8xbf16> to vector<8x8xbf16>
      %223 = vector.shape_cast %219 : vector<8x8xbf16> to vector<1x8x8xbf16>
      tpu.vector_store %arg18[%c2, %220, %c0_88], %223 {strides = array<i32>} : memref<4x8x8xbf16, #tpu.memory_space<vmem>>, vector<1x8x8xbf16>,
      %224 = vector.extract_strided_slice %198 {offsets = [0, 48], sizes = [8, 8], strides = [1, 1]} : vector<8x64xbf16> to vector<8x8xbf16>
      %c2_89 = arith.constant 2 : index
      %225 = arith.index_cast %157 : i32 to index
      %c0_90 = arith.constant 0 : index
      %226 = vector.load %arg19[%c2_89, %225, %c0_90] : memref<4x8x8xbf16, #tpu.memory_space<vmem>>, vector<1x8x8xbf16>
      %227 = vector.shape_cast %226 : vector<1x8x8xbf16> to vector<8x8xbf16>
      %228 = vector.shape_cast %224 : vector<8x8xbf16> to vector<1x8x8xbf16>
      tpu.vector_store %arg19[%c2_89, %225, %c0_90], %228 {strides = array<i32>} : memref<4x8x8xbf16, #tpu.memory_space<vmem>>, vector<1x8x8xbf16>,
      %229 = vector.extract_strided_slice %198 {offsets = [0, 24], sizes = [8, 8], strides = [1, 1]} : vector<8x64xbf16> to vector<8x8xbf16>
      %c3 = arith.constant 3 : index
      %230 = arith.index_cast %157 : i32 to index
      %c0_91 = arith.constant 0 : index
      %231 = vector.load %arg18[%c3, %230, %c0_91] : memref<4x8x8xbf16, #tpu.memory_space<vmem>>, vector<1x8x8xbf16>
      %232 = vector.shape_cast %231 : vector<1x8x8xbf16> to vector<8x8xbf16>
      %233 = vector.shape_cast %229 : vector<8x8xbf16> to vector<1x8x8xbf16>
      tpu.vector_store %arg18[%c3, %230, %c0_91], %233 {strides = array<i32>} : memref<4x8x8xbf16, #tpu.memory_space<vmem>>, vector<1x8x8xbf16>,
      %234 = vector.extract_strided_slice %198 {offsets = [0, 56], sizes = [8, 8], strides = [1, 1]} : vector<8x64xbf16> to vector<8x8xbf16>
      %c3_92 = arith.constant 3 : index
      %235 = arith.index_cast %157 : i32 to index
      %c0_93 = arith.constant 0 : index
      %236 = vector.load %arg19[%c3_92, %235, %c0_93] : memref<4x8x8xbf16, #tpu.memory_space<vmem>>, vector<1x8x8xbf16>
      %237 = vector.shape_cast %236 : vector<1x8x8xbf16> to vector<8x8xbf16>
      %238 = vector.shape_cast %234 : vector<8x8xbf16> to vector<1x8x8xbf16>
      tpu.vector_store %arg19[%c3_92, %235, %c0_93], %238 {strides = array<i32>} : memref<4x8x8xbf16, #tpu.memory_space<vmem>>, vector<1x8x8xbf16>,
      %c1_i32_94 = arith.constant 1 : i32
    } else {
    }
    %c8_i32 = arith.constant 8 : i32
    %3 = arith.muli %arg1, %c8_i32 : i32
    %4 = tpu.assume_multiple %3, 8 : i32
    %c0 = arith.constant 0 : index
    %5 = arith.index_cast %4 : i32 to index
    %c0_1 = arith.constant 0 : index
    %6 = vector.load %arg2[%c0, %5, %c0_1] : memref<1x8x32xbf16, #tpu.memory_space<vmem>>, vector<1x8x32xbf16>
    %7 = vector.shape_cast %6 : vector<1x8x32xbf16> to vector<8x32xbf16>
    %8 = arith.extf %7 : vector<8x32xbf16> to vector<8x32xf32>
    %c0_2 = arith.constant 0 : index
    %c0_3 = arith.constant 0 : index
    %9 = vector.load %arg3[%c0_2, %c0_3] : memref<1x32xf32, #tpu.memory_space<vmem>>, vector<1x32xf32>
    %10 = vector.shape_cast %9 : vector<1x32xf32> to vector<32xf32>
    %c0_4 = arith.constant 0 : index
    %c0_5 = arith.constant 0 : index
    %11 = vector.load %arg4[%c0_4, %c0_5] : memref<1x32xf32, #tpu.memory_space<vmem>>, vector<1x32xf32>
    %12 = vector.shape_cast %11 : vector<1x32xf32> to vector<32xf32>
    %cst = arith.constant dense<0.000000e+00> : vector<8xf32>
    %13 = vector.multi_reduction <add>, %8, %cst [1] : vector<8x32xf32> to vector<8xf32>
    %14 = vector.shape_cast %13 : vector<8xf32> to vector<8x1xf32>
    %cst_6 = arith.constant 3.200000e+01 : f32
    %15 = vector.broadcast %cst_6 : f32 to vector<8x1xf32>
    %16 = arith.divf %14, %15 : vector<8x1xf32>
    %17 = vector.broadcast %16 : vector<8x1xf32> to vector<8x32xf32>
    %18 = arith.subf %8, %17 : vector<8x32xf32>
    %19 = arith.mulf %18, %18 : vector<8x32xf32>
    %cst_7 = arith.constant dense<0.000000e+00> : vector<8xf32>
    %20 = vector.multi_reduction <add>, %19, %cst_7 [1] : vector<8x32xf32> to vector<8xf32>
    %21 = vector.shape_cast %20 : vector<8xf32> to vector<8x1xf32>
    %cst_8 = arith.constant 3.200000e+01 : f32
    %22 = vector.broadcast %cst_8 : f32 to vector<8x1xf32>
    %23 = arith.divf %21, %22 : vector<8x1xf32>
    %24 = vector.broadcast %16 : vector<8x1xf32> to vector<8x32xf32>
    %25 = arith.subf %8, %24 : vector<8x32xf32>
    %cst_9 = arith.constant 9.99999974E-6 : f32
    %26 = vector.broadcast %cst_9 : f32 to vector<8x1xf32>
    %27 = arith.addf %23, %26 : vector<8x1xf32>
    %28 = math.rsqrt %27 : vector<8x1xf32>
    %29 = vector.broadcast %28 : vector<8x1xf32> to vector<8x32xf32>
    %30 = arith.mulf %25, %29 : vector<8x32xf32>
    %31 = vector.shape_cast %10 : vector<32xf32> to vector<1x32xf32>
    %32 = vector.broadcast %31 : vector<1x32xf32> to vector<8x32xf32>
    %33 = arith.mulf %30, %32 : vector<8x32xf32>
    %34 = vector.shape_cast %12 : vector<32xf32> to vector<1x32xf32>
    %35 = vector.broadcast %34 : vector<1x32xf32> to vector<8x32xf32>
    %36 = arith.addf %33, %35 : vector<8x32xf32>
    %37 = arith.truncf %36 : vector<8x32xf32> to vector<8x32xbf16>
    %c0_10 = arith.constant 0 : index
    %c0_11 = arith.constant 0 : index
    %38 = vector.load %arg5[%c0_10, %c0_11] : memref<32x32xbf16, #tpu.memory_space<vmem>>, vector<32x32xbf16>
    %cst_12 = arith.constant dense<0.000000e+00> : vector<8x32xf32>
    %39 = tpu.matmul %37, %38, %cst_12 {dimension_numbers = #tpu.dot_dimension_numbers<[1], [0], [0], [1], [0, 0, 1, 1], [], []>} : vector<8x32xbf16>, vector<32x32xbf16>, vector<8x32xf32> -> vector<8x32xf32>
    %c0_13 = arith.constant 0 : index
    %c0_14 = arith.constant 0 : index
    %40 = vector.load %arg6[%c0_13, %c0_14] : memref<1x32xf32, #tpu.memory_space<vmem>>, vector<1x32xf32>
    %41 = vector.shape_cast %40 : vector<1x32xf32> to vector<32xf32>
    %42 = vector.shape_cast %41 : vector<32xf32> to vector<1x32xf32>
    %43 = vector.broadcast %42 : vector<1x32xf32> to vector<8x32xf32>
    %44 = arith.addf %39, %43 : vector<8x32xf32>
    %cst_15 = arith.constant 0.353553385 : f32
    %45 = vector.broadcast %cst_15 : f32 to vector<8x32xf32>
    %46 = arith.mulf %44, %45 : vector<8x32xf32>
    %47 = arith.truncf %46 : vector<8x32xf32> to vector<8x32xbf16>
    %48 = vector.extract_strided_slice %47 {offsets = [0, 0], sizes = [8, 8], strides = [1, 1]} : vector<8x32xbf16> to vector<8x8xbf16>
    %49 = vector.extract_strided_slice %47 {offsets = [0, 8], sizes = [8, 8], strides = [1, 1]} : vector<8x32xbf16> to vector<8x8xbf16>
    %50 = vector.extract_strided_slice %47 {offsets = [0, 16], sizes = [8, 8], strides = [1, 1]} : vector<8x32xbf16> to vector<8x8xbf16>
    %51 = vector.extract_strided_slice %47 {offsets = [0, 24], sizes = [8, 8], strides = [1, 1]} : vector<8x32xbf16> to vector<8x8xbf16>
    %52 = vector.shape_cast %48 : vector<8x8xbf16> to vector<1x8x8xbf16>
    %53 = vector.shape_cast %49 : vector<8x8xbf16> to vector<1x8x8xbf16>
    %54 = vector.shape_cast %50 : vector<8x8xbf16> to vector<1x8x8xbf16>
    %55 = vector.shape_cast %51 : vector<8x8xbf16> to vector<1x8x8xbf16>
    %56 = tpu.concatenate %52, %53, %54, %55 in 0 : vector<1x8x8xbf16>, vector<1x8x8xbf16>, vector<1x8x8xbf16>, vector<1x8x8xbf16> -> vector<4x8x8xbf16>
    %cst_16 = arith.constant 0xFF800000 : f32
    %57 = vector.broadcast %cst_16 : f32 to vector<4x8x1xf32>
    %cst_17 = arith.constant 0.000000e+00 : f32
    %58 = vector.broadcast %cst_17 : f32 to vector<4x8x1xf32>
    %cst_18 = arith.constant 0.000000e+00 : f32
    %59 = vector.broadcast %cst_18 : f32 to vector<4x8x8xf32>
    %c0_i32_19 = arith.constant 0 : i32
    %c8_i32_20 = arith.constant 8 : i32
    %60 = arith.muli %c0_i32_19, %c8_i32_20 : i32
    %61 = tpu.assume_multiple %60, 8 : i32
    %c0_21 = arith.constant 0 : index
    %62 = arith.index_cast %61 : i32 to index
    %c0_22 = arith.constant 0 : index
    %63 = vector.load %arg18[%c0_21, %62, %c0_22] : memref<4x8x8xbf16, #tpu.memory_space<vmem>>, vector<4x8x8xbf16>
    %c0_23 = arith.constant 0 : index
    %64 = arith.index_cast %61 : i32 to index
    %c0_24 = arith.constant 0 : index
    %65 = vector.load %arg19[%c0_23, %64, %c0_24] : memref<4x8x8xbf16, #tpu.memory_space<vmem>>, vector<4x8x8xbf16>
    "tpu.trace_start"() <{level = 10 : i32, message = "hqd,hkd->hqk"}> : () -> ()
    %cst_25 = arith.constant dense<0.000000e+00> : vector<4x8x8xf32>
    %66 = tpu.matmul %56, %63, %cst_25 {dimension_numbers = #tpu.dot_dimension_numbers<[2], [2], [1], [1], [0, 0, 0, 1, 1, 1], [0], [0]>} : vector<4x8x8xbf16>, vector<4x8x8xbf16>, vector<4x8x8xf32> -> vector<4x8x8xf32>
    "tpu.trace_stop"() : () -> ()
    %cst_26 = arith.constant dense<0xFF800000> : vector<4x8xf32>
    %67 = vector.multi_reduction <maximumf>, %66, %cst_26 [2] : vector<4x8x8xf32> to vector<4x8xf32>
    %68 = vector.shape_cast %67 : vector<4x8xf32> to vector<4x8x1xf32>
    %69 = arith.maximumf %57, %68 : vector<4x8x1xf32>
    %70 = arith.subf %57, %69 : vector<4x8x1xf32>
    %71 = math.exp %70 : vector<4x8x1xf32>
    %72 = vector.broadcast %69 : vector<4x8x1xf32> to vector<4x8x8xf32>
    %73 = arith.subf %66, %72 : vector<4x8x8xf32>
    %74 = math.exp %73 : vector<4x8x8xf32>
    %75 = arith.mulf %71, %58 : vector<4x8x1xf32>
    %cst_27 = arith.constant dense<0.000000e+00> : vector<4x8xf32>
    %76 = vector.multi_reduction <add>, %74, %cst_27 [2] : vector<4x8x8xf32> to vector<4x8xf32>
    %77 = vector.shape_cast %76 : vector<4x8xf32> to vector<4x8x1xf32>
    %78 = arith.addf %75, %77 : vector<4x8x1xf32>
    %79 = arith.truncf %74 : vector<4x8x8xf32> to vector<4x8x8xbf16>
    %80 = vector.broadcast %71 : vector<4x8x1xf32> to vector<4x8x8xf32>
    %81 = arith.mulf %80, %59 : vector<4x8x8xf32>
    "tpu.trace_start"() <{level = 10 : i32, message = "hqk,hkd->hqd"}> : () -> ()
    %cst_28 = arith.constant dense<0.000000e+00> : vector<4x8x8xf32>
    %82 = tpu.matmul %79, %65, %cst_28 {dimension_numbers = #tpu.dot_dimension_numbers<[2], [1], [1], [2], [0, 0, 0, 1, 1, 2], [0], [0]>} : vector<4x8x8xbf16>, vector<4x8x8xbf16>, vector<4x8x8xf32> -> vector<4x8x8xf32>
    "tpu.trace_stop"() : () -> ()
    %83 = arith.addf %81, %82 : vector<4x8x8xf32>
    %c1_i32 = arith.constant 1 : i32
    %84 = tpu.reciprocal %78 {approx = true} : vector<4x8x1xf32> -> vector<4x8x1xf32>
    %85 = vector.broadcast %84 : vector<4x8x1xf32> to vector<4x8x8xf32>
    %86 = arith.mulf %83, %85 : vector<4x8x8xf32>
    %87 = arith.truncf %86 : vector<4x8x8xf32> to vector<4x8x8xbf16>
    %c0_29 = arith.constant 0 : index
    %c0_30 = arith.constant 0 : index
    %c0_31 = arith.constant 0 : index
    %88 = vector.load %arg9[%c0_29, %c0_30, %c0_31] : memref<4x8x32xbf16, #tpu.memory_space<vmem>>, vector<4x8x32xbf16>
    "tpu.trace_start"() <{level = 10 : i32, message = "hqd,hdk->hqk"}> : () -> ()
    %cst_32 = arith.constant dense<0.000000e+00> : vector<4x8x32xf32>
    %89 = tpu.matmul %87, %88, %cst_32 {dimension_numbers = #tpu.dot_dimension_numbers<[2], [1], [1], [2], [0, 0, 0, 1, 1, 2], [0], [0]>} : vector<4x8x8xbf16>, vector<4x8x32xbf16>, vector<4x8x32xf32> -> vector<4x8x32xf32>
    "tpu.trace_stop"() : () -> ()
    %cst_33 = arith.constant dense<0.000000e+00> : vector<8x32xf32>
    %90 = vector.multi_reduction <add>, %89, %cst_33 [0] : vector<4x8x32xf32> to vector<8x32xf32>
    %c0_34 = arith.constant 0 : index
    %c0_35 = arith.constant 0 : index
    %91 = vector.load %arg10[%c0_34, %c0_35] : memref<1x32xf32, #tpu.memory_space<vmem>>, vector<1x32xf32>
    %92 = vector.shape_cast %91 : vector<1x32xf32> to vector<32xf32>
    %93 = vector.shape_cast %92 : vector<32xf32> to vector<1x32xf32>
    %94 = vector.broadcast %93 : vector<1x32xf32> to vector<8x32xf32>
    %95 = arith.addf %90, %94 : vector<8x32xf32>
    %96 = arith.addf %8, %95 : vector<8x32xf32>
    %c0_36 = arith.constant 0 : index
    %c0_37 = arith.constant 0 : index
    %97 = vector.load %arg11[%c0_36, %c0_37] : memref<1x32xf32, #tpu.memory_space<vmem>>, vector<1x32xf32>
    %98 = vector.shape_cast %97 : vector<1x32xf32> to vector<32xf32>
    %c0_38 = arith.constant 0 : index
    %c0_39 = arith.constant 0 : index
    %99 = vector.load %arg12[%c0_38, %c0_39] : memref<1x32xf32, #tpu.memory_space<vmem>>, vector<1x32xf32>
    %100 = vector.shape_cast %99 : vector<1x32xf32> to vector<32xf32>
    %cst_40 = arith.constant dense<0.000000e+00> : vector<8xf32>
    %101 = vector.multi_reduction <add>, %96, %cst_40 [1] : vector<8x32xf32> to vector<8xf32>
    %102 = vector.shape_cast %101 : vector<8xf32> to vector<8x1xf32>
    %cst_41 = arith.constant 3.200000e+01 : f32
    %103 = vector.broadcast %cst_41 : f32 to vector<8x1xf32>
    %104 = arith.divf %102, %103 : vector<8x1xf32>
    %105 = vector.broadcast %104 : vector<8x1xf32> to vector<8x32xf32>
    %106 = arith.subf %96, %105 : vector<8x32xf32>
    %107 = arith.mulf %106, %106 : vector<8x32xf32>
    %cst_42 = arith.constant dense<0.000000e+00> : vector<8xf32>
    %108 = vector.multi_reduction <add>, %107, %cst_42 [1] : vector<8x32xf32> to vector<8xf32>
    %109 = vector.shape_cast %108 : vector<8xf32> to vector<8x1xf32>
    %cst_43 = arith.constant 3.200000e+01 : f32
    %110 = vector.broadcast %cst_43 : f32 to vector<8x1xf32>
    %111 = arith.divf %109, %110 : vector<8x1xf32>
    %112 = vector.broadcast %104 : vector<8x1xf32> to vector<8x32xf32>
    %113 = arith.subf %96, %112 : vector<8x32xf32>
    %cst_44 = arith.constant 9.99999974E-6 : f32
    %114 = vector.broadcast %cst_44 : f32 to vector<8x1xf32>
    %115 = arith.addf %111, %114 : vector<8x1xf32>
    %116 = math.rsqrt %115 : vector<8x1xf32>
    %117 = vector.broadcast %116 : vector<8x1xf32> to vector<8x32xf32>
    %118 = arith.mulf %113, %117 : vector<8x32xf32>
    %119 = vector.shape_cast %98 : vector<32xf32> to vector<1x32xf32>
    %120 = vector.broadcast %119 : vector<1x32xf32> to vector<8x32xf32>
    %121 = arith.mulf %118, %120 : vector<8x32xf32>
    %122 = vector.shape_cast %100 : vector<32xf32> to vector<1x32xf32>
    %123 = vector.broadcast %122 : vector<1x32xf32> to vector<8x32xf32>
    %124 = arith.addf %121, %123 : vector<8x32xf32>
    %125 = arith.truncf %124 : vector<8x32xf32> to vector<8x32xbf16>
    %c0_45 = arith.constant 0 : index
    %c0_46 = arith.constant 0 : index
    %126 = vector.load %arg13[%c0_45, %c0_46] : memref<32x64xbf16, #tpu.memory_space<vmem>>, vector<32x64xbf16>
    %cst_47 = arith.constant dense<0.000000e+00> : vector<8x64xf32>
    %127 = tpu.matmul %125, %126, %cst_47 {dimension_numbers = #tpu.dot_dimension_numbers<[1], [0], [0], [1], [0, 0, 1, 1], [], []>} : vector<8x32xbf16>, vector<32x64xbf16>, vector<8x64xf32> -> vector<8x64xf32>
    %c0_48 = arith.constant 0 : index
    %c0_49 = arith.constant 0 : index
    %128 = vector.load %arg14[%c0_48, %c0_49] : memref<1x64xf32, #tpu.memory_space<vmem>>, vector<1x64xf32>
    %129 = vector.shape_cast %128 : vector<1x64xf32> to vector<64xf32>
    %130 = vector.shape_cast %129 : vector<64xf32> to vector<1x64xf32>
    %131 = vector.broadcast %130 : vector<1x64xf32> to vector<8x64xf32>
    %132 = arith.addf %127, %131 : vector<8x64xf32>
    %cst_50 = arith.constant 5.000000e-01 : f32
    %133 = vector.broadcast %cst_50 : f32 to vector<8x64xf32>
    %134 = arith.mulf %133, %132 : vector<8x64xf32>
    %cst_51 = arith.constant 0.707106769 : f32
    %135 = vector.broadcast %cst_51 : f32 to vector<8x64xf32>
    %136 = arith.mulf %132, %135 : vector<8x64xf32>
    %137 = math.erf %136 : vector<8x64xf32>
    %cst_52 = arith.constant 1.000000e+00 : f32
    %138 = vector.broadcast %cst_52 : f32 to vector<8x64xf32>
    %139 = arith.addf %138, %137 : vector<8x64xf32>
    %140 = arith.mulf %134, %139 : vector<8x64xf32>
    %141 = arith.truncf %140 : vector<8x64xf32> to vector<8x64xbf16>
    %c0_53 = arith.constant 0 : index
    %c0_54 = arith.constant 0 : index
    %142 = vector.load %arg15[%c0_53, %c0_54] : memref<64x32xbf16, #tpu.memory_space<vmem>>, vector<64x32xbf16>
    %cst_55 = arith.constant dense<0.000000e+00> : vector<8x32xf32>
    %143 = tpu.matmul %141, %142, %cst_55 {dimension_numbers = #tpu.dot_dimension_numbers<[1], [0], [0], [1], [0, 0, 1, 1], [], []>} : vector<8x64xbf16>, vector<64x32xbf16>, vector<8x32xf32> -> vector<8x32xf32>
    %c0_56 = arith.constant 0 : index
    %c0_57 = arith.constant 0 : index
    %144 = vector.load %arg16[%c0_56, %c0_57] : memref<1x32xf32, #tpu.memory_space<vmem>>, vector<1x32xf32>
    %145 = vector.shape_cast %144 : vector<1x32xf32> to vector<32xf32>
    %146 = vector.shape_cast %145 : vector<32xf32> to vector<1x32xf32>
    %147 = vector.broadcast %146 : vector<1x32xf32> to vector<8x32xf32>
    %148 = arith.addf %143, %147 : vector<8x32xf32>
    %149 = arith.addf %96, %148 : vector<8x32xf32>
    %150 = arith.truncf %149 : vector<8x32xf32> to vector<8x32xbf16>
    %c0_58 = arith.constant 0 : index
    %c0_59 = arith.constant 0 : index
    %c0_60 = arith.constant 0 : index
    %151 = vector.load %arg17[%c0_58, %c0_59, %c0_60] : memref<1x8x32xbf16, #tpu.memory_space<vmem>>, vector<1x8x32xbf16>
    %152 = vector.shape_cast %151 : vector<1x8x32xbf16> to vector<8x32xbf16>
    %153 = vector.shape_cast %150 : vector<8x32xbf16> to vector<1x8x32xbf16>
    tpu.vector_store %arg17[%c0_58, %c0_59, %c0_60], %153 {strides = array<i32>} : memref<1x8x32xbf16, #tpu.memory_space<vmem>>, vector<1x8x32xbf16>,
    return
  }
  func.func @transform_0(%arg0: i32, %arg1: i32) -> (i32, i32, i32) {
    %c0_i32 = arith.constant 0 : i32
    %c0_i32_0 = arith.constant 0 : i32
    %c0_i32_1 = arith.constant 0 : i32
    return %arg0, %c0_i32, %c0_i32_0 : i32, i32, i32
  }
  func.func @transform_1(%arg0: i32, %arg1: i32) -> (i32, i32) {
    %c0_i32 = arith.constant 0 : i32
    %c0_i32_0 = arith.constant 0 : i32
    %c0_i32_1 = arith.constant 0 : i32
    return %c0_i32, %c0_i32_0 : i32, i32
  }
  func.func @transform_2(%arg0: i32, %arg1: i32) -> (i32, i32) {
    %c0_i32 = arith.constant 0 : i32
    %c0_i32_0 = arith.constant 0 : i32
    %c0_i32_1 = arith.constant 0 : i32
    return %c0_i32, %c0_i32_0 : i32, i32
  }
  func.func @transform_3(%arg0: i32, %arg1: i32) -> (i32, i32) {
    %c0_i32 = arith.constant 0 : i32
    %c0_i32_0 = arith.constant 0 : i32
    %c0_i32_1 = arith.constant 0 : i32
    return %c0_i32, %c0_i32_0 : i32, i32
  }
  func.func @transform_4(%arg0: i32, %arg1: i32) -> (i32, i32) {
    %c0_i32 = arith.constant 0 : i32
    %c0_i32_0 = arith.constant 0 : i32
    %c0_i32_1 = arith.constant 0 : i32
    return %c0_i32, %c0_i32_0 : i32, i32
  }
  func.func @transform_5(%arg0: i32, %arg1: i32) -> (i32, i32) {
    %c0_i32 = arith.constant 0 : i32
    %c0_i32_0 = arith.constant 0 : i32
    %c0_i32_1 = arith.constant 0 : i32
    return %c0_i32, %c0_i32_0 : i32, i32
  }
  func.func @transform_6(%arg0: i32, %arg1: i32) -> (i32, i32) {
    %c0_i32 = arith.constant 0 : i32
    %c0_i32_0 = arith.constant 0 : i32
    %c0_i32_1 = arith.constant 0 : i32
    return %c0_i32, %c0_i32_0 : i32, i32
  }
  func.func @transform_7(%arg0: i32, %arg1: i32) -> (i32, i32, i32) {
    %c0_i32 = arith.constant 0 : i32
    %c0_i32_0 = arith.constant 0 : i32
    %c0_i32_1 = arith.constant 0 : i32
    %c0_i32_2 = arith.constant 0 : i32
    return %c0_i32, %c0_i32_0, %c0_i32_1 : i32, i32, i32
  }
  func.func @transform_8(%arg0: i32, %arg1: i32) -> (i32, i32) {
    %c0_i32 = arith.constant 0 : i32
    %c0_i32_0 = arith.constant 0 : i32
    %c0_i32_1 = arith.constant 0 : i32
    return %c0_i32, %c0_i32_0 : i32, i32
  }
  func.func @transform_9(%arg0: i32, %arg1: i32) -> (i32, i32) {
    %c0_i32 = arith.constant 0 : i32
    %c0_i32_0 = arith.constant 0 : i32
    %c0_i32_1 = arith.constant 0 : i32
    return %c0_i32, %c0_i32_0 : i32, i32
  }
  func.func @transform_10(%arg0: i32, %arg1: i32) -> (i32, i32) {
    %c0_i32 = arith.constant 0 : i32
    %c0_i32_0 = arith.constant 0 : i32
    %c0_i32_1 = arith.constant 0 : i32
    return %c0_i32, %c0_i32_0 : i32, i32
  }
  func.func @transform_11(%arg0: i32, %arg1: i32) -> (i32, i32) {
    %c0_i32 = arith.constant 0 : i32
    %c0_i32_0 = arith.constant 0 : i32
    %c0_i32_1 = arith.constant 0 : i32
    return %c0_i32, %c0_i32_0 : i32, i32
  }
  func.func @transform_12(%arg0: i32, %arg1: i32) -> (i32, i32) {
    %c0_i32 = arith.constant 0 : i32
    %c0_i32_0 = arith.constant 0 : i32
    %c0_i32_1 = arith.constant 0 : i32
    return %c0_i32, %c0_i32_0 : i32, i32
  }
  func.func @transform_13(%arg0: i32, %arg1: i32) -> (i32, i32) {
    %c0_i32 = arith.constant 0 : i32
    %c0_i32_0 = arith.constant 0 : i32
    %c0_i32_1 = arith.constant 0 : i32
    return %c0_i32, %c0_i32_0 : i32, i32
  }
  func.func @transform_14(%arg0: i32, %arg1: i32) -> (i32, i32) {
    %c0_i32 = arith.constant 0 : i32
    %c0_i32_0 = arith.constant 0 : i32
    %c0_i32_1 = arith.constant 0 : i32
    return %c0_i32, %c0_i32_0 : i32, i32
  }
  func.func @transform_15(%arg0: i32, %arg1: i32) -> (i32, i32, i32) {
    %c0_i32 = arith.constant 0 : i32
    %c0_i32_0 = arith.constant 0 : i32
    return %arg0, %arg1, %c0_i32 : i32, i32, i32
  }
}

</mosaic_0001>

<bundles_post_ra>
// kernel: tpu_custom_call.1
= control target key start
LH: loop header
LB: loop body
LE: loop exit
PB: predicated region body
PF: predicated region fallthrough
CT: control target
= control target key end

     0   :  { %s3007_s0 = inlined_call_operand.hbm [shape: bf16[2,8,32], index: 0, kind: input, shape index: {}]   ;;  %s3008_s1 = inlined_call_operand.vmem [shape: f32[1,32], index: 1, kind: input, shape index: {}]   ;;  %s3009_s2 = inlined_call_operand.vmem [shape: f32[1,32], index: 2, kind: input, shape index: {}]   ;;  %s3010_s3 = inlined_call_operand.vmem [shape: bf16[32,32], index: 3, kind: input, shape index: {}]   ;;  %s3011_s4 = inlined_call_operand.hbm [shape: f32[1,32], index: 4, kind: input, shape index: {}]   ;;  %s3012_s5 = inlined_call_operand.vmem [shape: bf16[32,64], index: 5, kind: input, shape index: {}]   ;;  %s3013_s6 = inlined_call_operand.hbm [shape: f32[1,64], index: 6, kind: input, shape index: {}]   ;;  %s3014_s7 = inlined_call_operand.vmem [shape: bf16[4,8,32], index: 7, kind: input, shape index: {}]   ;;  %s3015_s8 = inlined_call_operand.hbm [shape: f32[1,32], index: 8, kind: input, shape index: {}]   ;;  %s3016_s9 = inlined_call_operand.hbm [shape: f32[1,32], index: 9, kind: input, shape index: {}]   ;;  %s3017_s10 = inlined_call_operand.vmem [shape: f32[1,32], index: 10, kind: input, shape index: {}]   ;;  %s3018_s11 = inlined_call_operand.vmem [shape: bf16[32,64], index: 11, kind: input, shape index: {}]   ;;  %s3019_s12 = inlined_call_operand.vmem [shape: f32[1,64], index: 12, kind: input, shape index: {}]   ;;  %s3020_s13 = inlined_call_operand.vmem [shape: bf16[64,32], index: 13, kind: input, shape index: {}]   ;;  %s3021_s14 = inlined_call_operand.vmem [shape: f32[1,32], index: 14, kind: input, shape index: {}]   ;;  %s3022_s15 = inlined_call_operand.hbm [shape: bf16[2,8,32], index: 15, kind: output, shape index: {}]  }
   0x1   :  { %3031 = sst [smem:[#allocation19_spill]] %s3011_s4 }
   0x2   :  { %3032 = sst [smem:[#allocation20_spill]] %s3013_s6 }
   0x3   :  { %3033 = sst [smem:[#allocation21_spill]] %s3015_s8 }
   0x4   :  { %3034 = sst [smem:[#allocation22_spill]] %s3017_s10 }
   0x5   :  { %3035 = sst [smem:[#allocation23_spill]] %s3018_s11 }
   0x6   :  { %3036 = sst [smem:[#allocation24_spill]] %s3019_s12 }
   0x7   :  { %3037 = sst [smem:[#allocation25_spill]] %s3020_s13 }
   0x8   :  { %3038 = sst [smem:[#allocation26_spill]] %s3021_s14 }
   0x9   :  { %3039 = sst [smem:[#allocation27_spill]] %s3022_s15 }
   0xa   :  { %20 = vsyncpa [#allocation5], 0 }
   0xb   :  { %22 = vsyncpa [#allocation5 + $0x1], 0 }
   0xc   :  { %23 = vsyncpa [#allocation8], 0 }
   0xd   :  { %24 = vsyncpa [#allocation11], 0 }
   0xe   :  { %25 = vsyncpa [#allocation6], 0 }
   0xf   :  { %27 = vsyncpa [#allocation6 + $0x1], 0  ;;  %s2518_s18 = smov 0   ;;  %s2520_s19 = smov 0  }
  0x10   :  { %s2522_s20 = smov 0   ;;  %s2524_s21 = smov 0  }
  0x11   :  { %s2526_s22 = smov 0   ;;  %s2528_s23 = smov 0  }
  0x12 LB: > { %3040 = sst [smem:[#allocation18_spill]] %s2413_s21  ;;  %s3023_s24 = sadd.s32 4294967295, %s2421_s23   ;;  %s2421_s23 = sphi %s2528_s23, %s33_s23   ;;  %s2417_s22 = sphi %s2526_s22, %s3071_s22   ;;  %s2413_s21 = sphi %s2524_s21, %s3070_s21   ;;  %s2409_s20 = sphi %s2522_s20, %s3069_s20   ;;  %s2405_s19 = sphi %s2520_s19, %s3068_s19   ;;  %s2401_s18 = sphi %s2518_s18, %s3067_s18  }
  0x13   : > { %p1831_p0 = scmp.ge.s32.totalorder %s2421_s23, 1  ;;  %p2552_p1 = scmp.eq.s32.totalorder %s3023_s24, 0 }
  0x14   : > { %p398_p2 = scmp.lt.s32.totalorder %s2421_s23, 3  ;;  %s2423_s27 = smov [#allocation7]  }
  0x15   : > { %s3041_s25 = scalar_select %p2552_p1, 1, 0 }
  0x16   : > { %p2557_p3 = pnand %p1831_p0, %p398_p2  ;;  %s420_s28 = sshll.u32 %s2423_s27, 4  ;;  %s421_s28 = int_to_ptr.vmem [resolvable:$true] %s420_s28 }
  0x17   : > { %s2424_s29 = smov [#allocation10]   ;;  %s2425_s17 = smov [#allocation9]  }
  0x18   : > { %s3042_s26 = scalar_select %p2557_p3, 1, 0 }
  0x19   : > { %p2055_p5 = pneg %p2557_p3  ;;  %s448_s30 = sshll.u32 %s2424_s29, 4  ;;  %s2570_s30 = int_to_ptr.vmem [resolvable:$true] %s448_s30 }
  0x1a   : > { %s434_s24 = sshll.u32 %s2425_s17, 4  ;;  %s3044_s4 = sld [smem:[#allocation19_spill]]  ;;  %s2572_s24 = int_to_ptr.vmem [resolvable:$true] %s434_s24 }
  0x1b   : > { %p2566_p6 = pnand %p2055_p5, %p2552_p1 }
  0x1d   : > { %p2582_p8 = pneg %p2566_p6 }
  0x20   : > { %s2189_s14 = scalar_lea.hbm %s3044_s4, 16 }
  0x21   : > { %p2190_p7 = scmp.ne.s32.totalorder %s3044_s4, %s2189_s14  ;;  %p2196_p11 = scmp.lt.u32.totalorder %s2189_s14, %s3044_s4 }
  0x23   : > { %p2192_p9 = pnand %p2582_p8, %p2190_p7 }
  0x25   : > { %p2193_p10 = pneg %p2192_p9 }
  0x27   : > { %p2198_p12 = pnand %p2196_p11, %p2193_p10 }
  0x29   : > { %2201 = shalt.err (!%p2198_p12)
}
  0x2a   : > { %s2202_s15 = scalar_lea.vmem %s421_s28, 16  ;;  %s2209_s12 = scalar_lea.vmem %s421_s28, 32 }
  0x2b   : > { %p2203_p13 = scmp.ne.s32.totalorder %s421_s28, %s2202_s15  ;;  %p2210_p5 = scmp.lt.s32.totalorder %s421_s28, %s421_s28 }
  0x2c   : > { %p2211_p4 = scmp.lt.s32.totalorder %s2209_s12, %s2202_s15 }
  0x2d   : > { %p2205_p0 = pnand %p2203_p13, %p2582_p8 }
  0x2e   : > { %p2212_p3 = por %p2211_p4, %p2210_p5 }
  0x2f   : > { %p2206_p2 = pneg %p2205_p0 }
  0x31   : > { %p2213_p1 = pnand %p2212_p3, %p2206_p2 }
  0x33   : > { %2216 = shalt.err (!%p2213_p1)
}
  0x34   : > { %2058 = dma.hbm_to_vmem [thread:$0]  (!%p2566_p6), %s3044_s4, 16, %s421_s28, [#allocation8]  }
  0x35   : > { %s3046_s8 = sld [smem:[#allocation21_spill]] }
  0x3b   : > { %s2217_s17 = scalar_lea.hbm %s3046_s8, 16 }
  0x3c   : > { %p2218_p7 = scmp.ne.s32.totalorder %s3046_s8, %s2217_s17  ;;  %p2224_p1 = scmp.lt.u32.totalorder %s2217_s17, %s3046_s8 }
  0x3e   : > { %p2220_p9 = pnand %p2218_p7, %p2582_p8 }
  0x40   : > { %p2221_p4 = pneg %p2220_p9 }
  0x42   : > { %p2226_p3 = pnand %p2224_p1, %p2221_p4 }
  0x44   : > { %2229 = shalt.err (!%p2226_p3)
}
  0x45   : > { %s2230_s28 = scalar_lea.vmem %s2570_s30, 16  ;;  %s2237_s10 = scalar_lea.vmem %s2570_s30, 32 }
  0x46   : > { %p2231_p10 = scmp.ne.s32.totalorder %s2570_s30, %s2230_s28  ;;  %p2238_p13 = scmp.lt.s32.totalorder %s2570_s30, %s2570_s30 }
  0x47   : > { %p2239_p0 = scmp.lt.s32.totalorder %s2237_s10, %s2230_s28 }
  0x48   : > { %p2233_p11 = pnand %p2231_p10, %p2582_p8 }
  0x49   : > { %p2240_p2 = por %p2239_p0, %p2238_p13 }
  0x4a   : > { %p2234_p12 = pneg %p2233_p11 }
  0x4c   : > { %p2241_p5 = pnand %p2240_p2, %p2234_p12 }
  0x4e   : > { %2244 = shalt.err (!%p2241_p5)
}
  0x4f   : > { %2064 = dma.hbm_to_vmem [thread:$0]  (!%p2566_p6), %s3046_s8, 16, %s2570_s30, [#allocation11]  }
  0x50   : > { %s3047_s6 = sld [smem:[#allocation20_spill]] }
  0x56   : > { %s2245_s14 = scalar_lea.hbm %s3047_s6, 16 }
  0x57   : > { %p2246_p7 = scmp.ne.s32.totalorder %s3047_s6, %s2245_s14  ;;  %p2252_p1 = scmp.lt.u32.totalorder %s2245_s14, %s3047_s6 }
  0x59   : > { %p2248_p9 = pnand %p2246_p7, %p2582_p8 }
  0x5b   : > { %p2249_p4 = pneg %p2248_p9 }
  0x5d   : > { %p2254_p3 = pnand %p2252_p1, %p2249_p4 }
  0x5f   : > { %2257 = shalt.err (!%p2254_p3)
}
  0x60   : > { %s2258_s30 = scalar_lea.vmem %s2572_s24, 16  ;;  %s2265_s10 = scalar_lea.vmem %s2572_s24, 32 }
  0x61   : > { %p2259_p10 = scmp.ne.s32.totalorder %s2572_s24, %s2258_s30  ;;  %p2266_p13 = scmp.lt.s32.totalorder %s2572_s24, %s2572_s24 }
  0x62   : > { %p2267_p0 = scmp.lt.s32.totalorder %s2265_s10, %s2258_s30 }
  0x63   : > { %p2261_p11 = pnand %p2259_p10, %p2582_p8 }
  0x64   : > { %p2268_p2 = por %p2267_p0, %p2266_p13 }
  0x65   : > { %p2262_p12 = pneg %p2261_p11 }
  0x67   : > { %p2269_p5 = pnand %p2268_p2, %p2262_p12 }
  0x69   : > { %2272 = shalt.err (!%p2269_p5)
}
  0x6a   : > { %2061 = dma.hbm_to_vmem [thread:$0]  (!%p2566_p6), %s3047_s6, 16, %s2572_s24, [#allocation8]  }
  0x6b   : > { %s2426_s27 = smov [#allocation12]   ;;  %s2273_s15 = scalar_lea.hbm %s3016_s9, 16 }
  0x6c   : > { %s459_s13 = sshll.u32 %s2426_s27, 4  ;;  %p2274_p7 = scmp.ne.s32.totalorder %s3016_s9, %s2273_s15  ;;  %s460_s13 = int_to_ptr.vmem [resolvable:$true] %s459_s13 }
  0x6d   : > { %p2280_p1 = scmp.lt.u32.totalorder %s2273_s15, %s3016_s9 }
  0x6e   : > { %p2276_p9 = pnand %p2274_p7, %p2582_p8 }
  0x70   : > { %p2277_p4 = pneg %p2276_p9 }
  0x72   : > { %p2282_p3 = pnand %p2280_p1, %p2277_p4 }
  0x74   : > { %2285 = shalt.err (!%p2282_p3)
}
  0x75   : > { %s2286_s24 = scalar_lea.vmem %s460_s13, 16  ;;  %s2293_s11 = scalar_lea.vmem %s460_s13, 32 }
  0x76   : > { %p2287_p10 = scmp.ne.s32.totalorder %s460_s13, %s2286_s24  ;;  %p2294_p13 = scmp.lt.s32.totalorder %s460_s13, %s460_s13 }
  0x77   : > { %p2295_p0 = scmp.lt.s32.totalorder %s2293_s11, %s2286_s24 }
  0x78   : > { %p2289_p11 = pnand %p2287_p10, %p2582_p8 }
  0x79   : > { %p2296_p2 = por %p2295_p0, %p2294_p13 }
  0x7a   : > { %p2290_p12 = pneg %p2289_p11 }
  0x7c   : > { %p2297_p5 = pnand %p2296_p2, %p2290_p12 }
  0x7e   : > { %2300 = shalt.err (!%p2297_p5)
}
  0x7f   : > { %2067 = dma.hbm_to_vmem [thread:$0]  (!%p2566_p6), %s3016_s9, 16, %s460_s13, [#allocation11]  }
  0x80   : > { %s1830_s29 = sadd.s32 4294967294, %s2421_s23   ;;  %s45_s14 = sadd.s32 1, %s2417_s22 }
  0x81   : > { %p47_p8 = scmp.ge.s32.totalorder %s45_s14, 2  ;;  %s52_s16 = sadd.s32 1, %s2409_s20 }
  0x82   : > { %p59_p7 = scmp.ne.s32.totalorder %s2409_s20, %s2405_s19  ;;  %p60_p9 = scmp.eq.s32.totalorder %s2421_s23, 0 }
  0x83   : > { %s3073_s14 = smov (%p47_p8, %s45_s14), 0  ;;  %p65_p1 = scmp.ne.s32.totalorder %s2405_s19, %s2401_s18 }
  0x84   : > { %p2672_p4 = por %p60_p9, %p59_p7  ;;  %s49_s13 = ssub.s32 %s2417_s22, %s3073_s14 }
  0x85   : > { %s3049_s15 = sadd.s32 4294967295, %s2421_s23   ;;  %p50_p3 = scmp.eq.s32.totalorder %s49_s13, 0 }
  0x86   : > { %p385_p6 = scmp.eq.s32.totalorder %s3049_s15, 1  ;;  %p3050_p10 = scmp.ne.s32.totalorder %s3041_s25, 0 }
  0x87   : > { %p391_p13 = scmp.eq.s32.totalorder %s1830_s29, 1  ;;  %p2080_p2 = scmp.lt.s32.totalorder %s2421_s23, 2 }
  0x88   : > { %p2684_p11 = por %p3050_p10, %p65_p1  ;;  %p2688_p12 = por %p385_p6, %p59_p7 }
  0x89   : > { %s2693_s30 = scalar_select %p50_p3, %s2409_s20, %s52_s16  }
  0x8a   : > { %s3052_s28 = scalar_select %p2688_p12, 1, 0 }
  0x8b   : > { %p2695_p0 = por %p391_p13, %p65_p1  ;;  %s485_s24 = sand.u32 1, %s2409_s20  }
  0x8c   : > { %s1838_s11 = sshll.u32 %s2417_s22, 6  ;;  %s1837_s21 = sshll.u32 %s485_s24, 2 }
  0x8d   : > { %s3053_s10 = scalar_select %p2695_p0, 1, 0 }
  0x8e   : > { %s2705_s15 = scalar_lea.hbm %s3007_s0, %s1838_s11  ;;  %s489_s29 = scalar_lea.vmem [#allocation4], %s1837_s21 }
  0x8f   : > { %s496_s16 = sshll.u32 %s489_s29, 4  ;;  %p2709_p5 = pnand %p2080_p2, %p2672_p4  ;;  %s2713_s16 = int_to_ptr.vmem [resolvable:$true] %s496_s16 }
  0x90   : > { %s486_s6 = scalar_lea.sflag [#allocation5], %s485_s24  ;;  %s2301_s8 = scalar_lea.hbm %s2705_s15, 64 }
  0x91   : > { %p2302_p8 = scmp.ne.s32.totalorder %s2705_s15, %s2301_s8  ;;  %p2303_p7 = pneg %p2709_p5 }
  0x92   : > { %s2306_s17 = scalar_lea.hbm %s3007_s0, 128  ;;  %p2307_p4 = scmp.lt.u32.totalorder %s2705_s15, %s3007_s0 }
  0x93   : > { %p2304_p9 = pnand %p2303_p7, %p2302_p8  ;;  %p2308_p6 = scmp.lt.u32.totalorder %s2306_s17, %s2301_s8 }
  0x94   : > { %p2310_p10 = scmp.lt.u32.totalorder %s2301_s8, %s2705_s15 }
  0x95   : > { %p2305_p1 = pneg %p2304_p9  ;;  %p2309_p3 = por %p2308_p6, %p2307_p4 }
  0x97   : > { %p2311_p13 = por %p2310_p10, %p2309_p3 }
  0x99   : > { %p2312_p2 = pnand %p2311_p13, %p2305_p1 }
  0x9b   : > { %2315 = shalt.err (!%p2312_p2)
}
  0x9c   : > { %s2316_s24 = scalar_lea.vmem %s2713_s16, 64  ;;  %s2427_s29 = smov [#allocation4]  }
  0x9d   : > { %p2317_p8 = scmp.ne.s32.totalorder %s2713_s16, %s2316_s24  ;;  %s2321_s11 = sshll.u32 %s2427_s29, 4  ;;  %s2322_s11 = int_to_ptr.vmem [resolvable:$false] %s2321_s11 }
  0x9e   : > { %s2323_s21 = scalar_lea.vmem %s2322_s11, 128  ;;  %p2324_p12 = scmp.lt.s32.totalorder %s2713_s16, %s2322_s11 }
  0x9f   : > { %p2319_p9 = pnand %p2317_p8, %p2303_p7  ;;  %p2325_p4 = scmp.lt.s32.totalorder %s2323_s21, %s2316_s24 }
  0xa1   : > { %p2320_p0 = pneg %p2319_p9  ;;  %p2326_p6 = por %p2325_p4, %p2324_p12 }
  0xa3   : > { %p2327_p3 = pnand %p2326_p6, %p2320_p0 }
  0xa5   : > { %2330 = shalt.err (!%p2327_p3)
}
  0xa6   : > { %2071 = dma.hbm_to_vmem [thread:$0]  (!%p2709_p5), %s2705_s15, 64, %s2713_s16, %s486_s6  }
  0xa7   : > { %p3055_p1 = scmp.ne.s32.totalorder %s3042_s26, 0 }
  0xa8   : > { %s2743_s8 = sand.u32 (!%p3055_p1), 1, %s2405_s19  }
  0xa9   : > { %505 = sbr.rel (%p3055_p1) target bundleno = 2453 (0x995), region = 80  ;;  %s1840_s17 = sshll.u32 (!%p3055_p1), %s2743_s8, 2 }
  0xaa   : > { %s508_s27 = scalar_lea.sflag (!%p3055_p1), [#allocation5], %s2743_s8  ;;  %s511_s13 = scalar_lea.vmem (!%p3055_p1), [#allocation4], %s1840_s17 }
  0xb0   : > { %2384 = dma.done.wait (%p2684_p11), %s508_s27, 64  }
  0xb1   : > { %2386 = vsyncadd (%p2684_p11), %s508_s27, 4294967232  ;;  %p3056_p12 = scmp.ne.s32.totalorder %s3041_s25, 0 }
  0xb3   : > { %2388 = dma.done.wait (%p3056_p12), [#allocation8], 32  }
  0xb4   : > { %2390 = vsyncadd (%p3056_p12), [#allocation8], 4294967264 }
  0xb5   : > { %2392 = dma.done.wait (%p3056_p12), [#allocation11], 32  }
  0xb6   : > { %2394 = vsyncadd (%p3056_p12), [#allocation11], 4294967264  ;;  %vm583_vm0 = vcmask 261120   ;;  %v579_v0 = vld [vmem:[%s511_s13] sm:$0xf]  ;;  %v2428_v18 = vmov 0.0  }
  0xb7   : > { %v733_v1 = vld [vmem:[%s511_s13] sm:$0xf]  ;;  %v580_v2 = vunpack.c.l.bf16 %v579_v0  ;;  %1927 = vmatprep.subr.bf16.mxu0 %v2428_v18  ;;  %1935 = vmatprep.subr.bf16.mxu1 %v2428_v18  ;;  %v2148_v19 = vld [vmem:[%s3012_s5 + $0x8] sm:$0xff]   ;;  %vm2429_vm1 = vmmov 0   ;;  %vm680_vm2 = vcmask 60416   ;;  %s2430_s13 = smov 120  }
  0xb8   : > { %v2761_v3 = vunpack.c.l.bf16 %v733_v1  ;;  %v2147_v16 = vld [vmem:[%s3012_s5] sm:$0xff]   ;;  %1931 = vmatprep.mubr.msk.bf16.mxu0 %vm2429_vm1, %v2428_v18  ;;  %1939 = vmatprep.mubr.msk.bf16.mxu1 %vm2429_vm1, %v2428_v18  ;;  %v2150_v20 = vld [vmem:[%s3010_s3 + $0x8] sm:$0xff]   ;;  %s2431_s4 = smov 112   ;;  %s2432_s6 = smov 104   ;;  %vm850_vm3 = vcmask 64512   ;;  %vm1098_vm4 = vcmask 1043456  }
  0xb9   : > { %v584_v4 = vsel %vm583_vm0, %v580_v2, 0.0  ;;  %v2149_v17 = vld [vmem:[%s3010_s3] sm:$0xff]   ;;  %1928 = vmatpush3.bf16.msra.mxu0 %v2147_v16  ;;  %v1848_v39 = vld [vmem:[#allocation9] ss:$0 sm:$0xff]  ;;  %v1855_v44 = vld [vmem:[#allocation7] ss:$0 sm:$0xff] }
  0xba   : > { %v738_v5 = vsel %vm583_vm0, %v2761_v3, 0.0  ;;  %585 = vadd.xlane.f32.xlu0 %v584_v4  ;;  %1936 = vmatpush3.bf16.msra.mxu1 %v2149_v17  ;;  %v1846_v28 = vld [vmem:[%s3008_s1] ss:$0 sm:$0xff]  ;;  %s2433_s25 = smov 88   ;;  %s2434_s26 = smov 80   ;;  %vm1641_vm5 = vcmask 523264  }
  0xbb   : > { %1929 = vmatprep.subr.bf16.mxu0 %v2428_v18  ;;  %1937 = vmatprep.subr.bf16.mxu1 %v2428_v18  ;;  %v1847_v30 = vld [vmem:[%s3009_s2] ss:$0 sm:$0xff]  ;;  %s2435_s12 = smov 72   ;;  %s2436_s15 = smov 96   ;;  %vm1687_vm6 = vcmask 257024  }
  0xbc   : > { %s3058_s29 = sld [smem:[#allocation22_spill]]  ;;  %s3059_s27 = sld [smem:[#allocation25_spill]] }
  0xbd   : > { %1930 = vmatpush3.bf16.msra.mxu0 %v2148_v19  ;;  %s3061_s11 = sld [smem:[#allocation18_spill]]  ;;  %s3063_s24 = sld [smem:[#allocation27_spill]] }
  0xbe   : > { %739 = vadd.xlane.f32.xlu0 %v738_v5  ;;  %1943 = vmatprep.subr.bf16.mxu0 %v2428_v18  ;;  %s1690_s21 = scalar_lea.sflag [#allocation6], %s2743_s8  ;;  %p3064_p0 = scmp.ne.s32.totalorder %s3052_s28, 0 }
  0xbf   : > { %1938 = vmatpush3.bf16.msra.mxu1 %v2150_v20 }
  0xc0   : > { %1949 = vmatprep.subr.bf16.mxu1 %v2428_v18 }
 0x147   : > { %v586_v6 = vpop.xlane.xlu0 %585 }
 0x148   : > { %v588_v7 = vmul.f32 0.03125, %v586_v6 }
 0x14a   : > { %v589_v8 = vsub.f32 %v580_v2, %v588_v7 }
 0x14b   : > { %v740_v9 = vpop.xlane.xlu0 %739 }
 0x14c   : > { %v742_v10 = vmul.f32 0.03125, %v740_v9  ;;  %v590_v11 = vmul.f32 %v589_v8, %v589_v8 }
 0x14e   : > { %v743_v12 = vsub.f32 %v2761_v3, %v742_v10  ;;  %v591_v13 = vsel %vm583_vm0, %v590_v11, 0.0 }
 0x14f   : > { %592 = vadd.xlane.f32.xlu1 %v591_v13 }
 0x150   : > { %v744_v14 = vmul.f32 %v743_v12, %v743_v12 }
 0x152   : > { %v745_v15 = vsel %vm583_vm0, %v744_v14, 0.0 }
 0x153   : > { %746 = vadd.xlane.f32.xlu1 %v745_v15 }
 0x1dc   : > { %v593_v21 = vpop.xlane.xlu1 %592 }
 0x1dd   : > { %v594_v22 = vmul.f32 0.03125, %v593_v21 }
 0x1df   : > { %v595_v23 = vadd.f32 1e-05, %v594_v22 }
 0x1e0   : > { %v747_v24 = vpop.xlane.xlu1 %746 }
 0x1e1   : > { %2157 = vrsqrt.f32 %v595_v23  ;;  %v748_v25 = vmul.f32 0.03125, %v747_v24 }
 0x1e3   : > { %v749_v26 = vadd.f32 1e-05, %v748_v25 }
 0x1e5   : > { %2159 = vrsqrt.f32 %v749_v26 }
 0x1eb   : > { %v2158_v27 = vpop.eup %2157 }
 0x1ec   : > { %v597_v29 = vmul.f32 %v2158_v27, %v589_v8 }
 0x1ee   : > { %v604_v31 = vmul.f32 %v1846_v28, %v597_v29 }
 0x1ef   : > { %v2160_v32 = vpop.eup %2159 }
 0x1f0   : > { %v611_v33 = vadd.f32 %v1847_v30, %v604_v31  ;;  %v751_v34 = vmul.f32 %v2160_v32, %v743_v12 }
 0x1f2   : > { %v612_v35 = vpack.c.bf16 %v611_v33, %v611_v33  ;;  %v758_v36 = vmul.f32 %v1846_v28, %v751_v34 }
 0x1f4   : > { %1932 = vmatmul.mubr.msk.bf16.vlgmr.msra.gmra.mrb[0].mxu0 %vm583_vm0, %v612_v35  ;;  %v765_v37 = vadd.f32 %v1847_v30, %v758_v36 }
 0x1f5   : > { %1945 = vmatprep.mubr.msk.bf16.mxu0 %vm2429_vm1, %v2428_v18 }
 0x1f6   : > { %v766_v38 = vpack.c.bf16 %v765_v37, %v765_v37 }
 0x1f8   : > { %1940 = vmatmul.mubr.msk.bf16.vlgmr.msra.gmra.mrb[0].mxu1 %vm583_vm0, %v766_v38 }
 0x1f9   : > { %1951 = vmatprep.mubr.msk.bf16.mxu1 %vm2429_vm1, %v2428_v18 }
 0x2c7   : > { %v673_v40 = vpop.f32.mrb[0].mxu0 }
 0x2c8   : > { %v674_v41 = vadd.f32 %v1848_v39, %v673_v40  ;;  %v1933_v42 = vpop.f32.mrb[1].mxu0 }
 0x2c9   : > { %v676_v43 = vpop.f32.mrb[2].mxu0 }
 0x2ca   : > { %v2803_v45 = vpack.c.bf16 %v674_v41, %v674_v41  ;;  %v1934_v46 = vpop.f32.mrb[3].mxu0 }
 0x2cb   : > { %v827_v47 = vpop.f32.mrb[0].mxu1 }
 0x2cc   : > { %681 = vst.msk [vmem:[#allocation2] sm:$0xf] %vm680_vm2, %v2803_v45  ;;  %v828_v48 = vadd.f32 %v1855_v44, %v827_v47  ;;  %689 = vrot.lane.b32.xlu0 %v2803_v45, %s2430_s13  ;;  %702 = vrot.lane.b32.xlu1 %v2803_v45, %s2431_s4  ;;  %v1941_v49 = vpop.f32.mrb[1].mxu1 }
 0x2cd   : > { %v830_v50 = vpop.f32.mrb[2].mxu1 }
 0x2ce   : > { %v833_v51 = vmul.f32 0.35355338, %v828_v48  ;;  %v1942_v52 = vpop.f32.mrb[3].mxu1 }
 0x2d0   : > { %v834_v53 = vpack.c.bf16 %v833_v51, %v833_v51  ;;  %715 = vrot.lane.b32.xlu1 %v2803_v45, %s2432_s6 }
 0x2d2   : > { %838 = vrot.lane.b32.xlu0 %v834_v53, %s2431_s4  ;;  %s3062_s4 = sld [smem:[#allocation26_spill]] }
 0x2d3   : > { %v842_v54 = vld [vmem:[#allocation2] sm:$0xf] }
 0x2d4   : > { %836 = vrot.lane.b32.xlu1 %v834_v53, %s2430_s13  ;;  %v855_v55 = vsel %vm850_vm3, %v842_v54, 0 }
 0x2d5   : > { %1944 = vmatpush3.bf16.xpose.msra.mxu0 %v855_v55 }
 0x2d6   : > { %1955 = vmatprep.subr.bf16.mxu0 %v2428_v18 }
 0x2d8   : > { %840 = vrot.lane.b32.xlu1 %v834_v53, %s2432_s6  ;;  %s1885_s6 = sshll.u32 %s3061_s11, 6 }
 0x2dc   : > { %1946 = vmatmul.mubr.msk.bf16.vlgmr.msra.gmra.mrb[4].mxu0 %vm850_vm3, %v834_v53 }
 0x2dd   : > { %1957 = vmatprep.mubr.msk.bf16.mxu0 %vm2429_vm1, %v2428_v18 }
 0x33e   : > { %v703_v56 = vpop.permute.xlu1 %702  ;;  %v690_v57 = vpop.permute.xlu0 %689 }
 0x33f   : > { %708 = vst.msk [vmem:[#allocation2 + $0x8] sm:$0xf] %vm680_vm2, %v703_v56  ;;  %695 = vst.msk [vmem:[#allocation2 + $0x4] sm:$0xf] %vm680_vm2, %v690_v57 }
 0x342   : > { %v716_v58 = vpop.permute.xlu1 %715 }
 0x343   : > { %721 = vst.msk [vmem:[#allocation2 + $0xc] sm:$0xf] %vm680_vm2, %v716_v58 }
 0x344   : > { %v839_v0 = vpop.permute.xlu0 %838 }
 0x346   : > { %v843_v59 = vld [vmem:[#allocation2 + $0x4] sm:$0xf]  ;;  %v844_v60 = vld [vmem:[#allocation2 + $0x8] sm:$0xf]  ;;  %v837_v1 = vpop.permute.xlu1 %836 }
 0x347   : > { %v901_v61 = vsel %vm850_vm3, %v843_v59, 0  ;;  %v947_v62 = vsel %vm850_vm3, %v844_v60, 0 }
 0x348   : > { %1950 = vmatpush3.bf16.xpose.msra.mxu1 %v901_v61  ;;  %1956 = vmatpush3.bf16.xpose.msra.mxu0 %v947_v62  ;;  %v1297_v62 = vld [vmem:[%s3014_s7 + $0x4] sm:$0xf] }
 0x349   : > { %1961 = vmatprep.subr.bf16.mxu1 %v2428_v18  ;;  %1967 = vmatprep.subr.bf16.mxu0 %v2428_v18 }
 0x34a   : > { %v845_v63 = vld [vmem:[#allocation2 + $0xc] sm:$0xf]  ;;  %v841_v4 = vpop.permute.xlu1 %840 }
 0x34b   : > { %v993_v2 = vsel %vm850_vm3, %v845_v63, 0  ;;  %v1350_v63 = vsel %vm1098_vm4, %v1297_v62, 0 }
 0x34f   : > { %1952 = vmatmul.mubr.msk.bf16.vlgmr.msra.gmra.mrb[4].mxu1 %vm850_vm3, %v837_v1  ;;  %1958 = vmatmul.mubr.msk.bf16.vlgmr.msra.gmra.mrb[8].mxu0 %vm850_vm3, %v839_v0  ;;  %v1296_v0 = vld [vmem:[%s3014_s7] sm:$0xf] }
 0x350   : > { %1962 = vmatpush3.bf16.xpose.msra.mxu1 %v993_v2  ;;  %1963 = vmatprep.mubr.msk.bf16.mxu1 %vm2429_vm1, %v2428_v18  ;;  %v1304_v1 = vsel %vm1098_vm4, %v1296_v0, 0 }
 0x351   : > { %1973 = vmatprep.subr.bf16.mxu1 %v2428_v18  ;;  %1969 = vmatprep.mubr.msk.bf16.mxu0 %vm2429_vm1, %v2428_v18 }
 0x357   : > { %1964 = vmatmul.mubr.msk.bf16.vlgmr.msra.gmra.mrb[8].mxu1 %vm850_vm3, %v841_v4 }
 0x358   : > { %1975 = vmatprep.mubr.msk.bf16.mxu1 %vm2429_vm1, %v2428_v18 }
 0x3af   : > { %v891_v5 = vpop.f32.mrb[4].mxu0 }
 0x3b0   : > { %v1947_v6 = vpop.f32.mrb[5].mxu0  ;;  %v1035_v7 = vsel %vm850_vm3, %v891_v5, -inf }
 0x3b1   : > { %1036 = vmax.xlane.f32.xlu0 %v1035_v7  ;;  %v894_v8 = vpop.f32.mrb[6].mxu0 }
 0x3b2   : > { %v1948_v9 = vpop.f32.mrb[7].mxu0 }
 0x422   : > { %v937_v10 = vpop.f32.mrb[4].mxu1  ;;  %v983_v11 = vpop.f32.mrb[8].mxu0 }
 0x423   : > { %v1953_v12 = vpop.f32.mrb[5].mxu1  ;;  %v1959_v13 = vpop.f32.mrb[9].mxu0  ;;  %v1038_v14 = vsel %vm850_vm3, %v937_v10, -inf  ;;  %v1041_v15 = vsel %vm850_vm3, %v983_v11, -inf }
 0x424   : > { %1039 = vmax.xlane.f32.xlu1 %v1038_v14  ;;  %v940_v16 = vpop.f32.mrb[6].mxu1  ;;  %1042 = vmax.xlane.f32.xlu0 %v1041_v15  ;;  %v986_v17 = vpop.f32.mrb[10].mxu0 }
 0x425   : > { %v1954_v19 = vpop.f32.mrb[7].mxu1  ;;  %v1960_v20 = vpop.f32.mrb[11].mxu0 }
 0x42a   : > { %v1029_v21 = vpop.f32.mrb[8].mxu1 }
 0x42b   : > { %v1965_v22 = vpop.f32.mrb[9].mxu1  ;;  %v1044_v23 = vsel %vm850_vm3, %v1029_v21, -inf }
 0x42c   : > { %v1032_v24 = vpop.f32.mrb[10].mxu1  ;;  %1045 = vmax.xlane.f32.xlu0 %v1044_v23 }
 0x42d   : > { %v1966_v25 = vpop.f32.mrb[11].mxu1 }
 0x435   : > { %696 = vrot.lane.b32.xlu1 %v2803_v45, %s2433_s25  ;;  %s573_s25 = scalar_lea.vmem [#allocation13], %s1840_s17  ;;  %s2437_s17 = smov [#allocation13]  }
 0x436   : > { %s2335_s13 = sshll.u32 %s2437_s17, 4  ;;  %s2336_s13 = int_to_ptr.vmem [resolvable:$false] %s2335_s13 }
 0x439   : > { %709 = vrot.lane.b32.xlu1 %v2803_v45, %s2434_s26  ;;  %s3057_s26 = sld [smem:[#allocation23_spill]] }
 0x43d   : > { %722 = vrot.lane.b32.xlu1 %v2803_v45, %s2435_s12  ;;  %s1704_s12 = sshll.u32 %s573_s25, 4  ;;  %s2960_s12 = int_to_ptr.vmem [resolvable:$true] %s1704_s12 }
 0x43e   : > { %v2841_v26 = vpop.xlane.xlu0 %1036  ;;  %s2331_s11 = scalar_lea.vmem %s2960_s12, 64  ;;  %p2338_p10 = scmp.lt.s32.totalorder %s2960_s12, %s2336_s13 }
 0x43f   : > { %v1059_v27 = vsub.f32 %v891_v5, %v2841_v26  ;;  %v1047_v5 = vsub.f32 -inf, %v2841_v26  ;;  %p2332_p11 = scmp.ne.s32.totalorder %s2960_s12, %s2331_s11 }
 0x441   : > { %v1063_v28 = vmul.f32 1.442695, %v1059_v27  ;;  %v1051_v7 = vmul.f32 1.442695, %v1047_v5  ;;  %p2333_p5 = pnand %p2332_p11, %p3064_p0 }
 0x442   : > { %685 = vrot.lane.b32.xlu0 %v2803_v45, %s2436_s15 }
 0x443   : > { %2161 = vpow2.f32 %v1063_v28  ;;  %p2334_p7 = pneg %p2333_p5 }
 0x44d   : > { %v2162_v29 = vpop.eup %2161 }
 0x44e   : > { %v1075_v30 = vsel %vm850_vm3, %v2162_v29, 0.0  ;;  %v1091_v56 = vpack.c.bf16 %v2162_v29, %v2162_v29 }
 0x461   : > { %1076 = vadd.xlane.f32.xlu0 %v1075_v30 }
 0x4b1   : > { %v2845_v31 = vpop.xlane.xlu1 %1039  ;;  %v2847_v32 = vpop.xlane.xlu0 %1042 }
 0x4b2   : > { %v1060_v33 = vsub.f32 %v937_v10, %v2845_v31  ;;  %v1061_v34 = vsub.f32 %v983_v11, %v2847_v32  ;;  %v1048_v2 = vsub.f32 -inf, %v2845_v31  ;;  %v1049_v9 = vsub.f32 -inf, %v2847_v32 }
 0x4b4   : > { %v1065_v35 = vmul.f32 1.442695, %v1060_v33  ;;  %v1067_v36 = vmul.f32 1.442695, %v1061_v34  ;;  %v1053_v4 = vmul.f32 1.442695, %v1048_v2 }
 0x4b5   : > { %v697_v37 = vpop.permute.xlu1 %696  ;;  %v1055_v11 = vmul.f32 1.442695, %v1049_v9  ;;  %v1299_v33 = vld [vmem:[%s3014_s7 + $0xc] sm:$0xf] }
 0x4b6   : > { %701 = vst.msk [vmem:[#allocation3 + $0x4] sm:$0xf] %vm680_vm2, %v697_v37  ;;  %2163 = vpow2.f32 %v1065_v35  ;;  %v1442_v37 = vsel %vm1098_vm4, %v1299_v33, 0 }
 0x4b7   : > { %2165 = vpow2.f32 %v1067_v36 }
 0x4b9   : > { %v710_v38 = vpop.permute.xlu1 %709  ;;  %v1046_v39 = vpop.xlane.xlu0 %1045 }
 0x4ba   : > { %714 = vst.msk [vmem:[#allocation3 + $0x8] sm:$0xf] %vm680_vm2, %v710_v38  ;;  %v1062_v40 = vsub.f32 %v1029_v21, %v1046_v39  ;;  %v1050_v6 = vsub.f32 -inf, %v1046_v39 }
 0x4bc   : > { %v1069_v41 = vmul.f32 1.442695, %v1062_v40  ;;  %v1057_v8 = vmul.f32 1.442695, %v1050_v6 }
 0x4bd   : > { %v723_v42 = vpop.permute.xlu1 %722  ;;  %v686_v43 = vpop.permute.xlu0 %685  ;;  %v847_v44 = vld [vmem:[#allocation3 + $0x4] sm:$0xf] }
 0x4be   : > { %727 = vst.msk [vmem:[#allocation3 + $0xc] sm:$0xf] %vm680_vm2, %v723_v42  ;;  %688 = vst.msk [vmem:[#allocation3] sm:$0xf] %vm680_vm2, %v686_v43  ;;  %v1146_v45 = vsel %vm1098_vm4, %v847_v44, 0  ;;  %2167 = vpow2.f32 %v1069_v41 }
 0x4bf   : > { %1974 = vmatpush3.bf16.msra.mxu1 %v1146_v45  ;;  %2169 = vpow2.f32 %v1053_v4  ;;  %v1298_v44 = vld [vmem:[%s3014_s7 + $0x8] sm:$0xf] }
 0x4c0   : > { %1985 = vmatprep.subr.bf16.mxu1 %v2428_v18  ;;  %v2164_v46 = vpop.eup %2163  ;;  %2171 = vpow2.f32 %v1051_v7 }
 0x4c1   : > { %v1078_v47 = vsel %vm850_vm3, %v2164_v46, 0.0  ;;  %v1092_v48 = vpack.c.bf16 %v2164_v46, %v2164_v46  ;;  %v2166_v49 = vpop.eup %2165  ;;  %v848_v55 = vld [vmem:[#allocation3 + $0x8] sm:$0xf]  ;;  %2173 = vpow2.f32 %v1057_v8 }
 0x4c2   : > { %1079 = vadd.xlane.f32.xlu1 %v1078_v47  ;;  %v1081_v50 = vsel %vm850_vm3, %v2166_v49, 0.0  ;;  %v1192_v59 = vsel %vm1098_vm4, %v848_v55, 0  ;;  %v1093_v61 = vpack.c.bf16 %v2166_v49, %v2166_v49  ;;  %2175 = vpow2.f32 %v1055_v11 }
 0x4c3   : > { %1976 = vmatmul.mubr.msk.bf16.vlgmr.msra.gmra.mrb[12].mxu1 %vm850_vm3, %v1092_v48  ;;  %1082 = vadd.xlane.f32.xlu0 %v1081_v50 }
 0x4c4   : > { %1987 = vmatprep.mubr.msk.bf16.mxu1 %vm2429_vm1, %v2428_v18 }
 0x4c5   : > { %v846_v51 = vld [vmem:[#allocation3] sm:$0xf]  ;;  %v849_v52 = vld [vmem:[#allocation3 + $0xc] sm:$0xf] }
 0x4c6   : > { %v1100_v53 = vsel %vm1098_vm4, %v846_v51, 0  ;;  %v1238_v54 = vsel %vm1098_vm4, %v849_v52, 0 }
 0x4c7   : > { %1968 = vmatpush3.bf16.msra.mxu0 %v1100_v53  ;;  %1986 = vmatpush3.bf16.msra.mxu1 %v1238_v54  ;;  %v1396_v54 = vsel %vm1098_vm4, %v1298_v44, 0 }
 0x4c8   : > { %1979 = vmatprep.subr.bf16.mxu0 %v2428_v18  ;;  %1997 = vmatprep.subr.bf16.mxu1 %v2428_v18  ;;  %v2168_v57 = vpop.eup %2167 }
 0x4c9   : > { %v1084_v58 = vsel %vm850_vm3, %v2168_v57, 0.0  ;;  %v1094_v60 = vpack.c.bf16 %v2168_v57, %v2168_v57  ;;  %v2170_v10 = vpop.eup %2169 }
 0x4ca   : > { %1970 = vmatmul.mubr.msk.bf16.vlgmr.msra.gmra.mrb[12].mxu0 %vm850_vm3, %v1091_v56  ;;  %1085 = vadd.xlane.f32.xlu0 %v1084_v58  ;;  %v1072_v14 = vmul.f32 0.0, %v2170_v10  ;;  %v2172_v16 = vpop.eup %2171 }
 0x4cb   : > { %1980 = vmatpush3.bf16.msra.mxu0 %v1192_v59  ;;  %1988 = vmatmul.mubr.msk.bf16.vlgmr.msra.gmra.mrb[16].mxu1 %vm850_vm3, %v1094_v60  ;;  %v2174_v19 = vpop.eup %2173  ;;  %v1071_v20 = vmul.f32 0.0, %v2172_v16 }
 0x4cc   : > { %1981 = vmatprep.mubr.msk.bf16.mxu0 %vm2429_vm1, %v2428_v18  ;;  %1999 = vmatprep.mubr.msk.bf16.mxu1 %vm2429_vm1, %v2428_v18  ;;  %v1074_v23 = vmul.f32 0.0, %v2174_v19  ;;  %v2176_v25 = vpop.eup %2175 }
 0x4cd   : > { %1991 = vmatprep.subr.bf16.mxu0 %v2428_v18  ;;  %1998 = vmatpush3.bf16.msra.mxu1 %v1350_v63  ;;  %v1073_v26 = vmul.f32 0.0, %v2176_v25 }
 0x4ce   : > { %2009 = vmatprep.subr.bf16.mxu1 %v2428_v18 }
 0x4d2   : > { %1982 = vmatmul.mubr.msk.bf16.vlgmr.msra.gmra.mrb[16].mxu0 %vm850_vm3, %v1093_v61 }
 0x4d3   : > { %1993 = vmatprep.mubr.msk.bf16.mxu0 %vm2429_vm1, %v2428_v18  ;;  %1992 = vmatpush3.bf16.msra.mxu0 %v1304_v1 }
 0x4d4   : > { %2003 = vmatprep.subr.bf16.mxu0 %v2428_v18 }
 0x4ee   : > { %v1077_v12 = vpop.xlane.xlu0 %1076 }
 0x4ef   : > { %v1087_v22 = vadd.f32 %v1077_v12, %v1071_v20 }
 0x54f   : > { %v1080_v13 = vpop.xlane.xlu1 %1079 }
 0x550   : > { %v1088_v15 = vadd.f32 %v1080_v13, %v1072_v14  ;;  %v1083_v17 = vpop.xlane.xlu0 %1082 }
 0x551   : > { %v1089_v31 = vadd.f32 %v1083_v17, %v1073_v26 }
 0x552   : > { %2177 = vrcp.f32 %v1088_v15 }
 0x553   : > { %2179 = vrcp.f32 %v1087_v22 }
 0x557   : > { %v1086_v21 = vpop.xlane.xlu0 %1085 }
 0x558   : > { %v1090_v24 = vadd.f32 %v1086_v21, %v1074_v23 }
 0x55a   : > { %2181 = vrcp.f32 %v1090_v24 }
 0x55b   : > { %2183 = vrcp.f32 %v1089_v31 }
 0x55c   : > { %v2178_v30 = vpop.eup %2177 }
 0x55d   : > { %v2180_v41 = vpop.eup %2179 }
 0x564   : > { %v2182_v49 = vpop.eup %2181 }
 0x565   : > { %v2184_v59 = vpop.eup %2183 }
 0x596   : > { %v1182_v27 = vpop.f32.mrb[12].mxu1 }
 0x597   : > { %v1281_v28 = vadd.f32 %v1182_v27, %v1072_v14  ;;  %v1977_v29 = vpop.f32.mrb[13].mxu1 }
 0x598   : > { %v1185_v32 = vpop.f32.mrb[14].mxu1 }
 0x599   : > { %v1289_v34 = vmul.f32 %v2178_v30, %v1281_v28  ;;  %v1978_v35 = vpop.f32.mrb[15].mxu1 }
 0x59a   : > { %v2152_v35 = vld [vmem:[%s3057_s26 + $0x8] sm:$0xff]  }
 0x59b   : > { %v1293_v36 = vpack.c.bf16 %v1289_v34, %v1289_v34  ;;  %v2151_v34 = vld [vmem:[%s3057_s26] sm:$0xff]  }
 0x59d   : > { %v1136_v38 = vpop.f32.mrb[12].mxu0  ;;  %2000 = vmatmul.mubr.msk.bf16.vlgmr.msra.gmra.mrb[20].mxu1 %vm850_vm3, %v1293_v36 }
 0x59e   : > { %v1280_v39 = vadd.f32 %v1136_v38, %v1071_v20  ;;  %v1971_v40 = vpop.f32.mrb[13].mxu0  ;;  %v1274_v42 = vpop.f32.mrb[16].mxu1  ;;  %2010 = vmatpush3.bf16.msra.mxu1 %v1442_v37  ;;  %2011 = vmatprep.mubr.msk.bf16.mxu1 %vm2429_vm1, %v2428_v18 }
 0x59f   : > { %v1139_v43 = vpop.f32.mrb[14].mxu0  ;;  %v1283_v46 = vadd.f32 %v1274_v42, %v1074_v23  ;;  %v1989_v47 = vpop.f32.mrb[17].mxu1  ;;  %2023 = vmatprep.subr.bf16.mxu1 %v2428_v18  ;;  %v1871_v23 = vld [vmem:[#allocation10] ss:$0 sm:$0xff] }
 0x5a0   : > { %v1288_v45 = vmul.f32 %v2180_v41, %v1280_v39  ;;  %v1972_v48 = vpop.f32.mrb[15].mxu0  ;;  %v1277_v50 = vpop.f32.mrb[18].mxu1  ;;  %v1872_v39 = vld [vmem:[#allocation12] ss:$0 sm:$0xff]  ;;  %v1873_v41 = vld [vmem:[%s3058_s29] ss:$0 sm:$0xff] }
 0x5a1   : > { %v1291_v52 = vmul.f32 %v2182_v49, %v1283_v46  ;;  %v1990_v53 = vpop.f32.mrb[19].mxu1  ;;  %v2154_v46 = vld [vmem:[%s3059_s27 + $0x8] sm:$0xff]   ;;  %v2155_v47 = vld [vmem:[%s3059_s27 + $0x10] sm:$0xff]   ;;  %v2156_v48 = vld [vmem:[%s3059_s27 + $0x18] sm:$0xff]   ;;  %s3060_s29 = sld [smem:[#allocation24_spill]] }
 0x5a2   : > { %v1292_v51 = vpack.c.bf16 %v1288_v45, %v1288_v45  ;;  %v2153_v45 = vld [vmem:[%s3059_s27] sm:$0xff]  }
 0x5a3   : > { %v1295_v55 = vpack.c.bf16 %v1291_v52, %v1291_v52 }
 0x5a4   : > { %1994 = vmatmul.mubr.msk.bf16.vlgmr.msra.gmra.mrb[20].mxu0 %vm850_vm3, %v1292_v51 }
 0x5a5   : > { %v1228_v56 = vpop.f32.mrb[16].mxu0  ;;  %2004 = vmatpush3.bf16.msra.mxu0 %v1396_v54  ;;  %2005 = vmatprep.mubr.msk.bf16.mxu0 %vm2429_vm1, %v2428_v18 }
 0x5a6   : > { %v1282_v57 = vadd.f32 %v1228_v56, %v1073_v26  ;;  %2012 = vmatmul.mubr.msk.bf16.vlgmr.msra.gmra.mrb[24].mxu1 %vm850_vm3, %v1295_v55  ;;  %v1983_v58 = vpop.f32.mrb[17].mxu0  ;;  %2015 = vmatprep.subr.bf16.mxu0 %v2428_v18 }
 0x5a7   : > { %v1231_v60 = vpop.f32.mrb[18].mxu0  ;;  %2031 = vmatprep.mubr.msk.bf16.mxu1 %vm2429_vm1, %v2428_v18  ;;  %2024 = vmatpush3.bf16.msra.mxu1 %v2153_v45  ;;  %v1874_v49 = vld [vmem:[%s3060_s29] ss:$0 sm:$0xff]  ;;  %s2958_s29 = scalar_lea.hbm %s3063_s24, %s1885_s6 }
 0x5a8   : > { %v1290_v61 = vmul.f32 %v2184_v59, %v1282_v57  ;;  %v1984_v62 = vpop.f32.mrb[19].mxu0  ;;  %2025 = vmatprep.subr.bf16.mxu1 %v2428_v18  ;;  %v1878_v60 = vld [vmem:[%s3062_s4] ss:$0 sm:$0xff]  ;;  %s2337_s4 = scalar_lea.vmem %s2336_s13, 128 }
 0x5a9   : > { %p2339_p13 = scmp.lt.s32.totalorder %s2337_s4, %s2331_s11 }
 0x5aa   : > { %v1294_v63 = vpack.c.bf16 %v1290_v61, %v1290_v61 }
 0x5ab   : > { %2026 = vmatpush3.bf16.msra.mxu1 %v2154_v46  ;;  %p2340_p2 = por %p2339_p13, %p2338_p10 }
 0x5ac   : > { %2006 = vmatmul.mubr.msk.bf16.vlgmr.msra.gmra.mrb[24].mxu0 %vm850_vm3, %v1294_v63  ;;  %2027 = vmatprep.subr.bf16.mxu1 %v2428_v18 }
 0x5ad   : > { %2019 = vmatprep.mubr.msk.bf16.mxu0 %vm2429_vm1, %v2428_v18  ;;  %2016 = vmatpush3.bf16.msra.mxu0 %v2151_v34  ;;  %p2341_p8 = pnand %p2340_p2, %p2334_p7 }
 0x5ae   : > { %2017 = vmatprep.subr.bf16.mxu0 %v2428_v18 }
 0x5af   : > { %2028 = vmatpush3.bf16.msra.mxu1 %v2155_v47 }
 0x5b0   : > { %2029 = vmatprep.subr.bf16.mxu1 %v2428_v18 }
 0x5b1   : > { %2018 = vmatpush3.bf16.msra.mxu0 %v2152_v35 }
 0x5b3   : > { %2030 = vmatpush3.bf16.msra.mxu1 %v2156_v48 }
 0x670   : > { %v1386_v0 = vpop.f32.mrb[20].mxu1 }
 0x671   : > { %v2001_v1 = vpop.f32.mrb[21].mxu1  ;;  %v1485_v6 = vsel %vm583_vm0, %v1386_v0, 0.0 }
 0x672   : > { %v1389_v2 = vpop.f32.mrb[22].mxu1 }
 0x673   : > { %v2002_v4 = vpop.f32.mrb[23].mxu1 }
 0x677   : > { %v1340_v5 = vpop.f32.mrb[20].mxu0 }
 0x678   : > { %v1484_v7 = vsel %vm583_vm0, %v1340_v5, 0.0  ;;  %v1995_v8 = vpop.f32.mrb[21].mxu0 }
 0x679   : > { %v1486_v9 = vadd.f32 %v1485_v6, %v1484_v7  ;;  %v1478_v10 = vpop.f32.mrb[24].mxu1  ;;  %v1343_v11 = vpop.f32.mrb[22].mxu0 }
 0x67a   : > { %v2013_v12 = vpop.f32.mrb[25].mxu1  ;;  %v1996_v13 = vpop.f32.mrb[23].mxu0  ;;  %v1489_v22 = vsel %vm583_vm0, %v1478_v10, 0.0 }
 0x67b   : > { %v1481_v14 = vpop.f32.mrb[26].mxu1 }
 0x67c   : > { %v2014_v15 = vpop.f32.mrb[27].mxu1 }
 0x67f   : > { %v1432_v16 = vpop.f32.mrb[24].mxu0 }
 0x680   : > { %v1487_v17 = vsel %vm583_vm0, %v1432_v16, 0.0  ;;  %v2007_v19 = vpop.f32.mrb[25].mxu0 }
 0x681   : > { %v1488_v20 = vadd.f32 %v1487_v17, %v1486_v9  ;;  %v1435_v21 = vpop.f32.mrb[26].mxu0 }
 0x682   : > { %v2008_v24 = vpop.f32.mrb[27].mxu0 }
 0x683   : > { %v1490_v25 = vadd.f32 %v1489_v22, %v1488_v20 }
 0x685   : > { %v1498_v26 = vadd.f32 %v1871_v23, %v1490_v25 }
 0x687   : > { %v1499_v27 = vadd.f32 %v1498_v26, %v2761_v3 }
 0x689   : > { %v1502_v28 = vsel %vm583_vm0, %v1499_v27, 0.0 }
 0x68a   : > { %1503 = vadd.xlane.f32.xlu0 %v1502_v28 }
 0x717   : > { %v1504_v29 = vpop.xlane.xlu0 %1503 }
 0x718   : > { %v1505_v30 = vmul.f32 0.03125, %v1504_v29 }
 0x71a   : > { %v1506_v31 = vsub.f32 %v1499_v27, %v1505_v30 }
 0x71c   : > { %v1507_v32 = vmul.f32 %v1506_v31, %v1506_v31 }
 0x71e   : > { %v1508_v33 = vsel %vm583_vm0, %v1507_v32, 0.0 }
 0x71f   : > { %1509 = vadd.xlane.f32.xlu1 %v1508_v33 }
 0x7ac   : > { %v1510_v3 = vpop.xlane.xlu1 %1509 }
 0x7ad   : > { %v1511_v36 = vmul.f32 0.03125, %v1510_v3 }
 0x7af   : > { %v1512_v37 = vadd.f32 1e-05, %v1511_v36 }
 0x7b1   : > { %2185 = vrsqrt.f32 %v1512_v37 }
 0x7bb   : > { %v2186_v38 = vpop.eup %2185 }
 0x7bc   : > { %v1514_v40 = vmul.f32 %v2186_v38, %v1506_v31 }
 0x7be   : > { %v1521_v42 = vmul.f32 %v1872_v39, %v1514_v40 }
 0x7c0   : > { %v1528_v43 = vadd.f32 %v1873_v41, %v1521_v42 }
 0x7c2   : > { %v1529_v44 = vpack.c.bf16 %v1528_v43, %v1528_v43 }
 0x7c4   : > { %2020 = vmatmul.mubr.msk.bf16.vlgmr.msra.gmra.mrb[28].mxu0 %vm583_vm0, %v1529_v44 }
 0x897   : > { %v1590_v50 = vpop.f32.mrb[28].mxu0 }
 0x898   : > { %v1591_v51 = vadd.f32 %v1874_v49, %v1590_v50  ;;  %v2021_v52 = vpop.f32.mrb[29].mxu0 }
 0x899   : > { %v1593_v53 = vpop.f32.mrb[30].mxu0 }
 0x89a   : > { %v1597_v54 = vmul.f32 0.70710677, %v1591_v51  ;;  %v2022_v55 = vpop.f32.mrb[31].mxu0  ;;  %v1596_v18 = vmul.f32 0.5, %v1591_v51 }
 0x89c   : > { %2187 = verf.f32 %v1597_v54 }
 0x8a6   : > { %v2188_v56 = vpop.eup %2187 }
 0x8a7   : > { %v1599_v57 = vadd.f32 1.0, %v2188_v56 }
 0x8a9   : > { %v1600_v58 = vmul.f32 %v1599_v57, %v1596_v18 }
 0x8ab   : > { %v1601_v59 = vpack.c.bf16 %v1600_v58, %v1600_v58 }
 0x8ad   : > { %2032 = vmatmul.mubr.msk.bf16.vlgmr.msra.gmra.mrb[28].mxu1 %vm1641_vm5, %v1601_v59 }
 0x980   : > { %v1679_v61 = vpop.f32.mrb[28].mxu1 }
 0x981   : > { %v1680_v62 = vadd.f32 %v1878_v60, %v1679_v61  ;;  %v2033_v63 = vpop.f32.mrb[29].mxu1 }
 0x982   : > { %v1682_v0 = vpop.f32.mrb[30].mxu1 }
 0x983   : > { %v1685_v1 = vadd.f32 %v1680_v62, %v1499_v27  ;;  %v2034_v2 = vpop.f32.mrb[31].mxu1 }
 0x985   : > { %v1686_v4 = vpack.c.bf16 %v1685_v1, %v1685_v1 }
 0x987   : > { %1688 = vst.msk [vmem:[%s573_s25] sm:$0xf] %vm1687_vm6, %v1686_v4 }
 0x988   : > { %2344 = shalt.err (!%p2341_p8)
}
 0x989   : > { %s2345_s8 = scalar_lea.hbm %s2958_s29, 64  ;;  %s2349_s15 = scalar_lea.hbm %s3063_s24, 128 }
 0x98a   : > { %p2346_p9 = scmp.ne.s32.totalorder %s2958_s29, %s2345_s8  ;;  %p2350_p3 = scmp.lt.u32.totalorder %s2958_s29, %s3063_s24 }
 0x98b   : > { %p2351_p1 = scmp.lt.u32.totalorder %s2349_s15, %s2345_s8  ;;  %p2353_p11 = scmp.lt.u32.totalorder %s2345_s8, %s2958_s29 }
 0x98c   : > { %p2347_p4 = pnand %p2346_p9, %p3064_p0 }
 0x98d   : > { %p2352_p12 = por %p2351_p1, %p2350_p3 }
 0x98e   : > { %p2348_p6 = pneg %p2347_p4 }
 0x98f   : > { %p2354_p5 = por %p2353_p11, %p2352_p12 }
 0x991   : > { %p2355_p7 = pnand %p2354_p5, %p2348_p6 }
 0x993   : > { %2358 = shalt.err (!%p2355_p7)
}
 0x994   : > { %2053 = dma.vmem_to_hbm [thread:$0]  (%p3064_p0), %s2960_s12, 64, %s2958_s29, %s1690_s21  }
 0x995 PF: > { %s1716_s11 = sand.u32 1, %s2401_s18   ;;  %p3065_p10 = scmp.ne.s32.totalorder %s3053_s10, 0 }
 0x996   : > { %p3066_p13 = scmp.ge.s32.totalorder %s2421_s23, 2  ;;  %s1717_s13 = scalar_lea.sflag [#allocation6], %s1716_s11 }
 0x998   : > { %p2073_p2 = pnand %p3066_p13, %p3065_p10 }
 0x99a   : > { %2396 = dma.done.wait (!%p2073_p2), %s1717_s13, 64  }
 0x99b   : > { %2398 = vsyncadd (!%p2073_p2), %s1717_s13, 4294967232  ;;  %s33_s23 = sadd.s32 1, %s2421_s23   ;;  %s3067_s18 = smov %s2405_s19 }
 0x99c   : > { %p30_p8 = scmp.ge.s32.totalorder %s33_s23, 4   ;;  %s3068_s19 = smov %s2409_s20 }
 0x99d   : > { %s3069_s20 = smov %s2693_s30  ;;  %s3070_s21 = smov %s2417_s22 }
 0x99e   : > { %s3071_s22 = smov %s3073_s14  ;;  %32 = sbr.rel (!%p30_p8) target bundleno = 18 (0x12), region = 152 }
 0x9a5   :  { %1722 = vsyncpa [#allocation5], 1 }
 0x9a6   :  { %1724 = vsyncpa [#allocation5 + $0x1], 1 }
 0x9a7   :  { %1725 = vsyncpa [#allocation8], 1 }
 0x9a8   :  { %1726 = vsyncpa [#allocation11], 1 }
 0x9a9   :  { %1727 = vsyncpa [#allocation6], 1 }
 0x9aa   :  { %1729 = vsyncpa [#allocation6 + $0x1], 1 }

</bundles_post_ra>
